<compile_context>
chip_gen: v6e
topology: v6e:2x2x1
jax: 0.10.0
libtpu: 0.0.40
codegen_flags: <defaults>
</compile_context>

<pallas_src>
import jax
import jax.numpy as jnp
from jax.experimental import pallas as pl
from jax.experimental.pallas import tpu as pltpu

PAD = 128          # lane padding for every feature dimension
N_VECS = 24        # packed BN scale/shift + bias rows
N_WEIGHTS = 9      # packed (in, out) weight matrices


def _leaky(v):
    return jnp.where(v > 0, v, 0.01 * v)


# Packed-vector row indices (each row is a 128-lane, zero-padded f32 vector):
#  0 bn1_scale   1 bn1_shift   2 b1
#  3 bn2_sx      4 bn2_bx      5 bn2_sh      6 bn2_bh      7 b2
#  8 bn20_s      9 bn20_b     10 b20
# 11 bn3_sa     12 bn3_ba     13 bn3_sb     14 bn3_bb     15 b3
# 16 bn30_s     17 bn30_b     18 b30
# 19 bn4_sa     20 bn4_ba     21 bn4_sb     22 bn4_bb     23 b5
#
# Packed-weight indices (each (128,128) bf16, (in, out) layout):
#  0 w1   1 w2[:, :F]   2 w2[:, F:]   3 w20
#  4 w3[:, :H]   5 w3[:, H:]   6 w30   7 w5[:, :H]   8 w5[:, H:]
def resnet_kernel(x_ref, vec_ref, w_ref, out_ref):
    def vec(i):                     # (1, 128) f32 broadcast row
        return vec_ref[i:i + 1, :]

    def mm(act, k):                 # bf16 operands on the MXU, f32 accumulate
        return jnp.dot(act.astype(jnp.bfloat16), w_ref[k],
                       preferred_element_type=jnp.float32)

    x = x_ref[...]

    # ---- block 1: bn1 -> dense1 -> leaky ----
    h = x * vec(0) + vec(1)
    x1 = _leaky(mm(h, 0) + vec(2))

    # ---- block 2: bn2(cat[x, x1]) -> dense2 -> leaky -> bn20 -> dense20 -> leaky ----
    a = x * vec(3) + vec(4)
    b = x1 * vec(5) + vec(6)
    x2 = _leaky(mm(a, 1) + mm(b, 2) + vec(7))
    x2 = x2 * vec(8) + vec(9)
    x2 = _leaky(mm(x2, 3) + vec(10))

    # ---- block 3: bn3(cat[x1, x2]) -> dense3 -> leaky -> bn30 -> dense30 -> leaky ----
    a = x1 * vec(11) + vec(12)
    b = x2 * vec(13) + vec(14)
    x3 = _leaky(mm(a, 4) + mm(b, 5) + vec(15))
    x3 = x3 * vec(16) + vec(17)
    x3 = _leaky(mm(x3, 6) + vec(18))

    # ---- head: bn4(cat[x2, x3]) -> dense5 ----
    a = x2 * vec(19) + vec(20)
    b = x3 * vec(21) + vec(22)
    out_ref[...] = mm(a, 7) + mm(b, 8) + vec(23)


def resnet_forward_pallas(x, vecs, weights, num_targets, *, tb=128):
    """x: (B, F) f32. vecs: (24, 128) f32. weights: (9, 128, 128) bf16."""
    B, F = x.shape
    P = vecs.shape[1]
    n_blocks = -(-B // tb)
    b_pad = n_blocks * tb

    # Zero-pad batch to a TB multiple and features to 128 lanes.
    x_p = jnp.zeros((b_pad, P), jnp.float32).at[:B, :F].set(x)

    flops = 2 * b_pad * P * P * N_WEIGHTS
    bytes_accessed = x_p.size * 4 + vecs.size * 4 + weights.size * 2 + b_pad * P * 4
    # weights + vecs resident, x/out double-buffered, plus headroom.
    vmem_need = (weights.size * 2 + vecs.size * 4 + 4 * tb * P * 4)
    vmem_limit = min(max(4 * vmem_need, 16 << 20), 32 << 20)

    out_p = pl.pallas_call(
        resnet_kernel,
        out_shape=jax.ShapeDtypeStruct((b_pad, P), jnp.float32),
        grid_spec=pltpu.PrefetchScalarGridSpec(
            num_scalar_prefetch=0,
            grid=(n_blocks,),
            in_specs=[
                pl.BlockSpec((tb, P), lambda i: (i, 0)),              # x tile
                pl.BlockSpec((N_VECS, P), lambda i: (0, 0)),          # packed vecs
                pl.BlockSpec((N_WEIGHTS, P, P), lambda i: (0, 0, 0)),  # packed weights
            ],
            out_specs=pl.BlockSpec((tb, P), lambda i: (i, 0)),
        ),
        compiler_params=pltpu.CompilerParams(
            dimension_semantics=("parallel",),
            vmem_limit_bytes=vmem_limit,
        ),
        cost_estimate=pl.CostEstimate(
            flops=flops, transcendentals=0, bytes_accessed=bytes_accessed),
    )(x_p, vecs, weights)

    return out_p[:B, :num_targets]


# ------------------------- parameter construction (glue) -------------------------

def _bn_affine(key, n, eps=1e-5):
    kg, kb, km, kv = jax.random.split(key, 4)
    gamma = 1.0 + 0.1 * jax.random.normal(kg, (n,), dtype=jnp.float32)
    beta = 0.1 * jax.random.normal(kb, (n,), dtype=jnp.float32)
    mean = 0.1 * jax.random.normal(km, (n,), dtype=jnp.float32)
    var = jax.random.uniform(kv, (n,), minval=0.5, maxval=1.5, dtype=jnp.float32)
    scale = gamma / jnp.sqrt(var + eps)
    shift = beta - mean * scale
    return scale, shift


def _weight_norm_linear(key, fan_in, fan_out):
    kv, kg, kb = jax.random.split(key, 3)
    v = 0.05 * jax.random.normal(kv, (fan_out, fan_in), dtype=jnp.float32)
    g = jax.random.uniform(kg, (fan_out, 1), minval=0.5, maxval=1.5, dtype=jnp.float32)
    bias = 0.05 * jax.random.normal(kb, (fan_out,), dtype=jnp.float32)
    norm = jnp.sqrt(jnp.sum(v * v, axis=1, keepdims=True))
    w = g * v / norm          # (out, in) — effective weight_norm weight
    return w, bias


def make_params(key, num_features, hidden_size, num_targets, pad=PAD):
    F, H, T = num_features, hidden_size, num_targets
    P = pad
    keys = jax.random.split(key, 12)

    bn1_s, bn1_b = _bn_affine(keys[0], F)
    w1, b1 = _weight_norm_linear(keys[1], F, H)
    bn2_s, bn2_b = _bn_affine(keys[2], F + H)
    w2, b2 = _weight_norm_linear(keys[3], F + H, H)
    bn20_s, bn20_b = _bn_affine(keys[4], H)
    w20, b20 = _weight_norm_linear(keys[5], H, H)
    bn3_s, bn3_b = _bn_affine(keys[6], 2 * H)
    w3, b3 = _weight_norm_linear(keys[7], 2 * H, H)
    bn30_s, bn30_b = _bn_affine(keys[8], H)
    w30, b30 = _weight_norm_linear(keys[9], H, H)
    bn4_s, bn4_b = _bn_affine(keys[10], 2 * H)
    w5, b5 = _weight_norm_linear(keys[11], 2 * H, T)

    def padv(v):
        return jnp.zeros((P,), jnp.float32).at[: v.shape[0]].set(v)

    def padw(w):  # (out, in) torch layout -> zero-padded (P, P) in (in, out) layout
        wt = w.T
        return jnp.zeros((P, P), jnp.float32).at[: wt.shape[0], : wt.shape[1]].set(wt)

    vec_list = [
        bn1_s, bn1_b, b1,
        bn2_s[:F], bn2_b[:F], bn2_s[F:], bn2_b[F:], b2,
        bn20_s, bn20_b, b20,
        bn3_s[:H], bn3_b[:H], bn3_s[H:], bn3_b[H:], b3,
        bn30_s, bn30_b, b30,
        bn4_s[:H], bn4_b[:H], bn4_s[H:], bn4_b[H:], b5,
    ]
    vecs = jnp.stack([padv(v) for v in vec_list], axis=0)            # (24, P) f32

    w_list = [
        w1,
        w2[:, :F], w2[:, F:],
        w20,
        w3[:, :H], w3[:, H:],
        w30,
        w5[:, :H], w5[:, H:],
    ]
    weights = jnp.stack([padw(w) for w in w_list], axis=0).astype(jnp.bfloat16)

    raw = dict(
        bn1=(bn1_s, bn1_b), d1=(w1, b1),
        bn2=(bn2_s, bn2_b), d2=(w2, b2),
        bn20=(bn20_s, bn20_b), d20=(w20, b20),
        bn3=(bn3_s, bn3_b), d3=(w3, b3),
        bn30=(bn30_s, bn30_b), d30=(w30, b30),
        bn4=(bn4_s, bn4_b), d5=(w5, b5),
    )
    return vecs, weights, raw


def reference_forward(x, raw):
    """Pure-JAX mirror of the PyTorch forward (eval mode) with real concats.
    Dot operands are cast to bf16 (f32 accumulation) to mirror the kernel."""
    bn = lambda v, p: v * p[0] + p[1]

    def lin(v, p):
        w, bias = p
        return jnp.dot(v.astype(jnp.bfloat16), w.T.astype(jnp.bfloat16),
                       preferred_element_type=jnp.float32) + bias

    x1 = _leaky(lin(bn(x, raw["bn1"]), raw["d1"]))
    xc = jnp.concatenate([x, x1], axis=1)
    x2 = _leaky(lin(bn(xc, raw["bn2"]), raw["d2"]))
    x2 = _leaky(lin(bn(x2, raw["bn20"]), raw["d20"]))
    xc = jnp.concatenate([x1, x2], axis=1)
    x3 = _leaky(lin(bn(xc, raw["bn3"]), raw["d3"]))
    x3 = _leaky(lin(bn(x3, raw["bn30"]), raw["d30"]))
    xc = jnp.concatenate([x2, x3], axis=1)
    return lin(bn(xc, raw["bn4"]), raw["d5"])


if __name__ == "__main__":
    NUM_FEATURES = 16
    HIDDEN = 32
    NUM_TARGETS = 8
    BATCH = 256      # small demo batch; grid of 2 × 128-row tiles
    TB = 128

    key = jax.random.PRNGKey(0)
    kx, kp = jax.random.split(key)
    x = jax.random.normal(kx, (BATCH, NUM_FEATURES), dtype=jnp.float32)

    vecs, weights, raw_params = make_params(kp, NUM_FEATURES, HIDDEN, NUM_TARGETS)

    out = resnet_forward_pallas(x, vecs, weights, NUM_TARGETS, tb=TB)
    out = jax.block_until_ready(out)

    ref = reference_forward(x, raw_params)
    assert out.shape == (BATCH, NUM_TARGETS)
    assert jnp.allclose(out, ref, atol=1e-4, rtol=1e-3), "mismatch vs reference"

    print("KERNEL_OK")
</pallas_src>

<mosaic_0001>
module attributes {stable_mosaic.version = 11 : i64} {
  func.func @resnet_kernel(%arg0: i32, %arg1: memref<128x128xf32, #tpu.memory_space<vmem>>, %arg2: memref<24x128xf32, #tpu.memory_space<vmem>>, %arg3: memref<9x128x128xbf16, #tpu.memory_space<vmem>>, %arg4: memref<128x128xf32, #tpu.memory_space<vmem>>) attributes {dimension_semantics = [#tpu.dimension_semantics<parallel>], iteration_bounds = array<i64: 2>, scalar_prefetch = 0 : i64, scratch_operands = 0 : i64, tpu.core_type = #tpu.core_type<tc>, window_params = [{transform_indices = @transform_0, window_bounds = array<i64: 128, 128>}, {pipeline_mode = #tpu.pipeline_mode<synchronous>, transform_indices = @transform_1, window_bounds = array<i64: 24, 128>}, {pipeline_mode = #tpu.pipeline_mode<synchronous>, transform_indices = @transform_2, window_bounds = array<i64: 9, 128, 128>}, {transform_indices = @transform_3, window_bounds = array<i64: 128, 128>}]} {
    %c0 = arith.constant 0 : index
    %c0_0 = arith.constant 0 : index
    %0 = vector.load %arg1[%c0, %c0_0] : memref<128x128xf32, #tpu.memory_space<vmem>>, vector<128x128xf32>
    %c0_1 = arith.constant 0 : index
    %c0_2 = arith.constant 0 : index
    %1 = vector.load %arg2[%c0_1, %c0_2] : memref<24x128xf32, #tpu.memory_space<vmem>>, vector<1x128xf32>
    %2 = vector.broadcast %1 : vector<1x128xf32> to vector<128x128xf32>
    %3 = arith.mulf %0, %2 : vector<128x128xf32>
    %c1 = arith.constant 1 : index
    %c0_3 = arith.constant 0 : index
    %4 = vector.load %arg2[%c1, %c0_3] : memref<24x128xf32, #tpu.memory_space<vmem>>, vector<1x128xf32>
    %5 = vector.broadcast %4 : vector<1x128xf32> to vector<128x128xf32>
    %6 = arith.addf %3, %5 : vector<128x128xf32>
    %7 = arith.truncf %6 : vector<128x128xf32> to vector<128x128xbf16>
    %c0_4 = arith.constant 0 : index
    %c0_5 = arith.constant 0 : index
    %c0_6 = arith.constant 0 : index
    %8 = vector.load %arg3[%c0_4, %c0_5, %c0_6] : memref<9x128x128xbf16, #tpu.memory_space<vmem>>, vector<1x128x128xbf16>
    %9 = vector.shape_cast %8 : vector<1x128x128xbf16> to vector<128x128xbf16>
    %cst = arith.constant dense<0.000000e+00> : vector<128x128xf32>
    %10 = tpu.matmul %7, %9, %cst {dimension_numbers = #tpu.dot_dimension_numbers<[1], [0], [0], [1], [0, 0, 1, 1], [], []>} : vector<128x128xbf16>, vector<128x128xbf16>, vector<128x128xf32> -> vector<128x128xf32>
    %c2 = arith.constant 2 : index
    %c0_7 = arith.constant 0 : index
    %11 = vector.load %arg2[%c2, %c0_7] : memref<24x128xf32, #tpu.memory_space<vmem>>, vector<1x128xf32>
    %12 = vector.broadcast %11 : vector<1x128xf32> to vector<128x128xf32>
    %13 = arith.addf %10, %12 : vector<128x128xf32>
    %cst_8 = arith.constant 0.000000e+00 : f32
    %14 = vector.broadcast %cst_8 : f32 to vector<128x128xf32>
    %15 = arith.cmpf ogt, %13, %14 : vector<128x128xf32>
    %cst_9 = arith.constant 0.00999999977 : f32
    %16 = vector.broadcast %cst_9 : f32 to vector<128x128xf32>
    %17 = arith.mulf %16, %13 : vector<128x128xf32>
    %18 = arith.select %15, %13, %17 : vector<128x128xi1>, vector<128x128xf32>
    %c3 = arith.constant 3 : index
    %c0_10 = arith.constant 0 : index
    %19 = vector.load %arg2[%c3, %c0_10] : memref<24x128xf32, #tpu.memory_space<vmem>>, vector<1x128xf32>
    %20 = vector.broadcast %19 : vector<1x128xf32> to vector<128x128xf32>
    %21 = arith.mulf %0, %20 : vector<128x128xf32>
    %c4 = arith.constant 4 : index
    %c0_11 = arith.constant 0 : index
    %22 = vector.load %arg2[%c4, %c0_11] : memref<24x128xf32, #tpu.memory_space<vmem>>, vector<1x128xf32>
    %23 = vector.broadcast %22 : vector<1x128xf32> to vector<128x128xf32>
    %24 = arith.addf %21, %23 : vector<128x128xf32>
    %c5 = arith.constant 5 : index
    %c0_12 = arith.constant 0 : index
    %25 = vector.load %arg2[%c5, %c0_12] : memref<24x128xf32, #tpu.memory_space<vmem>>, vector<1x128xf32>
    %26 = vector.broadcast %25 : vector<1x128xf32> to vector<128x128xf32>
    %27 = arith.mulf %18, %26 : vector<128x128xf32>
    %c6 = arith.constant 6 : index
    %c0_13 = arith.constant 0 : index
    %28 = vector.load %arg2[%c6, %c0_13] : memref<24x128xf32, #tpu.memory_space<vmem>>, vector<1x128xf32>
    %29 = vector.broadcast %28 : vector<1x128xf32> to vector<128x128xf32>
    %30 = arith.addf %27, %29 : vector<128x128xf32>
    %31 = arith.truncf %24 : vector<128x128xf32> to vector<128x128xbf16>
    %c1_14 = arith.constant 1 : index
    %c0_15 = arith.constant 0 : index
    %c0_16 = arith.constant 0 : index
    %32 = vector.load %arg3[%c1_14, %c0_15, %c0_16] : memref<9x128x128xbf16, #tpu.memory_space<vmem>>, vector<1x128x128xbf16>
    %33 = vector.shape_cast %32 : vector<1x128x128xbf16> to vector<128x128xbf16>
    %cst_17 = arith.constant dense<0.000000e+00> : vector<128x128xf32>
    %34 = tpu.matmul %31, %33, %cst_17 {dimension_numbers = #tpu.dot_dimension_numbers<[1], [0], [0], [1], [0, 0, 1, 1], [], []>} : vector<128x128xbf16>, vector<128x128xbf16>, vector<128x128xf32> -> vector<128x128xf32>
    %35 = arith.truncf %30 : vector<128x128xf32> to vector<128x128xbf16>
    %c2_18 = arith.constant 2 : index
    %c0_19 = arith.constant 0 : index
    %c0_20 = arith.constant 0 : index
    %36 = vector.load %arg3[%c2_18, %c0_19, %c0_20] : memref<9x128x128xbf16, #tpu.memory_space<vmem>>, vector<1x128x128xbf16>
    %37 = vector.shape_cast %36 : vector<1x128x128xbf16> to vector<128x128xbf16>
    %cst_21 = arith.constant dense<0.000000e+00> : vector<128x128xf32>
    %38 = tpu.matmul %35, %37, %cst_21 {dimension_numbers = #tpu.dot_dimension_numbers<[1], [0], [0], [1], [0, 0, 1, 1], [], []>} : vector<128x128xbf16>, vector<128x128xbf16>, vector<128x128xf32> -> vector<128x128xf32>
    %39 = arith.addf %34, %38 : vector<128x128xf32>
    %c7 = arith.constant 7 : index
    %c0_22 = arith.constant 0 : index
    %40 = vector.load %arg2[%c7, %c0_22] : memref<24x128xf32, #tpu.memory_space<vmem>>, vector<1x128xf32>
    %41 = vector.broadcast %40 : vector<1x128xf32> to vector<128x128xf32>
    %42 = arith.addf %39, %41 : vector<128x128xf32>
    %cst_23 = arith.constant 0.000000e+00 : f32
    %43 = vector.broadcast %cst_23 : f32 to vector<128x128xf32>
    %44 = arith.cmpf ogt, %42, %43 : vector<128x128xf32>
    %cst_24 = arith.constant 0.00999999977 : f32
    %45 = vector.broadcast %cst_24 : f32 to vector<128x128xf32>
    %46 = arith.mulf %45, %42 : vector<128x128xf32>
    %47 = arith.select %44, %42, %46 : vector<128x128xi1>, vector<128x128xf32>
    %c8 = arith.constant 8 : index
    %c0_25 = arith.constant 0 : index
    %48 = vector.load %arg2[%c8, %c0_25] : memref<24x128xf32, #tpu.memory_space<vmem>>, vector<1x128xf32>
    %49 = vector.broadcast %48 : vector<1x128xf32> to vector<128x128xf32>
    %50 = arith.mulf %47, %49 : vector<128x128xf32>
    %c9 = arith.constant 9 : index
    %c0_26 = arith.constant 0 : index
    %51 = vector.load %arg2[%c9, %c0_26] : memref<24x128xf32, #tpu.memory_space<vmem>>, vector<1x128xf32>
    %52 = vector.broadcast %51 : vector<1x128xf32> to vector<128x128xf32>
    %53 = arith.addf %50, %52 : vector<128x128xf32>
    %54 = arith.truncf %53 : vector<128x128xf32> to vector<128x128xbf16>
    %c3_27 = arith.constant 3 : index
    %c0_28 = arith.constant 0 : index
    %c0_29 = arith.constant 0 : index
    %55 = vector.load %arg3[%c3_27, %c0_28, %c0_29] : memref<9x128x128xbf16, #tpu.memory_space<vmem>>, vector<1x128x128xbf16>
    %56 = vector.shape_cast %55 : vector<1x128x128xbf16> to vector<128x128xbf16>
    %cst_30 = arith.constant dense<0.000000e+00> : vector<128x128xf32>
    %57 = tpu.matmul %54, %56, %cst_30 {dimension_numbers = #tpu.dot_dimension_numbers<[1], [0], [0], [1], [0, 0, 1, 1], [], []>} : vector<128x128xbf16>, vector<128x128xbf16>, vector<128x128xf32> -> vector<128x128xf32>
    %c10 = arith.constant 10 : index
    %c0_31 = arith.constant 0 : index
    %58 = vector.load %arg2[%c10, %c0_31] : memref<24x128xf32, #tpu.memory_space<vmem>>, vector<1x128xf32>
    %59 = vector.broadcast %58 : vector<1x128xf32> to vector<128x128xf32>
    %60 = arith.addf %57, %59 : vector<128x128xf32>
    %cst_32 = arith.constant 0.000000e+00 : f32
    %61 = vector.broadcast %cst_32 : f32 to vector<128x128xf32>
    %62 = arith.cmpf ogt, %60, %61 : vector<128x128xf32>
    %cst_33 = arith.constant 0.00999999977 : f32
    %63 = vector.broadcast %cst_33 : f32 to vector<128x128xf32>
    %64 = arith.mulf %63, %60 : vector<128x128xf32>
    %65 = arith.select %62, %60, %64 : vector<128x128xi1>, vector<128x128xf32>
    %c11 = arith.constant 11 : index
    %c0_34 = arith.constant 0 : index
    %66 = vector.load %arg2[%c11, %c0_34] : memref<24x128xf32, #tpu.memory_space<vmem>>, vector<1x128xf32>
    %67 = vector.broadcast %66 : vector<1x128xf32> to vector<128x128xf32>
    %68 = arith.mulf %18, %67 : vector<128x128xf32>
    %c12 = arith.constant 12 : index
    %c0_35 = arith.constant 0 : index
    %69 = vector.load %arg2[%c12, %c0_35] : memref<24x128xf32, #tpu.memory_space<vmem>>, vector<1x128xf32>
    %70 = vector.broadcast %69 : vector<1x128xf32> to vector<128x128xf32>
    %71 = arith.addf %68, %70 : vector<128x128xf32>
    %c13 = arith.constant 13 : index
    %c0_36 = arith.constant 0 : index
    %72 = vector.load %arg2[%c13, %c0_36] : memref<24x128xf32, #tpu.memory_space<vmem>>, vector<1x128xf32>
    %73 = vector.broadcast %72 : vector<1x128xf32> to vector<128x128xf32>
    %74 = arith.mulf %65, %73 : vector<128x128xf32>
    %c14 = arith.constant 14 : index
    %c0_37 = arith.constant 0 : index
    %75 = vector.load %arg2[%c14, %c0_37] : memref<24x128xf32, #tpu.memory_space<vmem>>, vector<1x128xf32>
    %76 = vector.broadcast %75 : vector<1x128xf32> to vector<128x128xf32>
    %77 = arith.addf %74, %76 : vector<128x128xf32>
    %78 = arith.truncf %71 : vector<128x128xf32> to vector<128x128xbf16>
    %c4_38 = arith.constant 4 : index
    %c0_39 = arith.constant 0 : index
    %c0_40 = arith.constant 0 : index
    %79 = vector.load %arg3[%c4_38, %c0_39, %c0_40] : memref<9x128x128xbf16, #tpu.memory_space<vmem>>, vector<1x128x128xbf16>
    %80 = vector.shape_cast %79 : vector<1x128x128xbf16> to vector<128x128xbf16>
    %cst_41 = arith.constant dense<0.000000e+00> : vector<128x128xf32>
    %81 = tpu.matmul %78, %80, %cst_41 {dimension_numbers = #tpu.dot_dimension_numbers<[1], [0], [0], [1], [0, 0, 1, 1], [], []>} : vector<128x128xbf16>, vector<128x128xbf16>, vector<128x128xf32> -> vector<128x128xf32>
    %82 = arith.truncf %77 : vector<128x128xf32> to vector<128x128xbf16>
    %c5_42 = arith.constant 5 : index
    %c0_43 = arith.constant 0 : index
    %c0_44 = arith.constant 0 : index
    %83 = vector.load %arg3[%c5_42, %c0_43, %c0_44] : memref<9x128x128xbf16, #tpu.memory_space<vmem>>, vector<1x128x128xbf16>
    %84 = vector.shape_cast %83 : vector<1x128x128xbf16> to vector<128x128xbf16>
    %cst_45 = arith.constant dense<0.000000e+00> : vector<128x128xf32>
    %85 = tpu.matmul %82, %84, %cst_45 {dimension_numbers = #tpu.dot_dimension_numbers<[1], [0], [0], [1], [0, 0, 1, 1], [], []>} : vector<128x128xbf16>, vector<128x128xbf16>, vector<128x128xf32> -> vector<128x128xf32>
    %86 = arith.addf %81, %85 : vector<128x128xf32>
    %c15 = arith.constant 15 : index
    %c0_46 = arith.constant 0 : index
    %87 = vector.load %arg2[%c15, %c0_46] : memref<24x128xf32, #tpu.memory_space<vmem>>, vector<1x128xf32>
    %88 = vector.broadcast %87 : vector<1x128xf32> to vector<128x128xf32>
    %89 = arith.addf %86, %88 : vector<128x128xf32>
    %cst_47 = arith.constant 0.000000e+00 : f32
    %90 = vector.broadcast %cst_47 : f32 to vector<128x128xf32>
    %91 = arith.cmpf ogt, %89, %90 : vector<128x128xf32>
    %cst_48 = arith.constant 0.00999999977 : f32
    %92 = vector.broadcast %cst_48 : f32 to vector<128x128xf32>
    %93 = arith.mulf %92, %89 : vector<128x128xf32>
    %94 = arith.select %91, %89, %93 : vector<128x128xi1>, vector<128x128xf32>
    %c16 = arith.constant 16 : index
    %c0_49 = arith.constant 0 : index
    %95 = vector.load %arg2[%c16, %c0_49] : memref<24x128xf32, #tpu.memory_space<vmem>>, vector<1x128xf32>
    %96 = vector.broadcast %95 : vector<1x128xf32> to vector<128x128xf32>
    %97 = arith.mulf %94, %96 : vector<128x128xf32>
    %c17 = arith.constant 17 : index
    %c0_50 = arith.constant 0 : index
    %98 = vector.load %arg2[%c17, %c0_50] : memref<24x128xf32, #tpu.memory_space<vmem>>, vector<1x128xf32>
    %99 = vector.broadcast %98 : vector<1x128xf32> to vector<128x128xf32>
    %100 = arith.addf %97, %99 : vector<128x128xf32>
    %101 = arith.truncf %100 : vector<128x128xf32> to vector<128x128xbf16>
    %c6_51 = arith.constant 6 : index
    %c0_52 = arith.constant 0 : index
    %c0_53 = arith.constant 0 : index
    %102 = vector.load %arg3[%c6_51, %c0_52, %c0_53] : memref<9x128x128xbf16, #tpu.memory_space<vmem>>, vector<1x128x128xbf16>
    %103 = vector.shape_cast %102 : vector<1x128x128xbf16> to vector<128x128xbf16>
    %cst_54 = arith.constant dense<0.000000e+00> : vector<128x128xf32>
    %104 = tpu.matmul %101, %103, %cst_54 {dimension_numbers = #tpu.dot_dimension_numbers<[1], [0], [0], [1], [0, 0, 1, 1], [], []>} : vector<128x128xbf16>, vector<128x128xbf16>, vector<128x128xf32> -> vector<128x128xf32>
    %c18 = arith.constant 18 : index
    %c0_55 = arith.constant 0 : index
    %105 = vector.load %arg2[%c18, %c0_55] : memref<24x128xf32, #tpu.memory_space<vmem>>, vector<1x128xf32>
    %106 = vector.broadcast %105 : vector<1x128xf32> to vector<128x128xf32>
    %107 = arith.addf %104, %106 : vector<128x128xf32>
    %cst_56 = arith.constant 0.000000e+00 : f32
    %108 = vector.broadcast %cst_56 : f32 to vector<128x128xf32>
    %109 = arith.cmpf ogt, %107, %108 : vector<128x128xf32>
    %cst_57 = arith.constant 0.00999999977 : f32
    %110 = vector.broadcast %cst_57 : f32 to vector<128x128xf32>
    %111 = arith.mulf %110, %107 : vector<128x128xf32>
    %112 = arith.select %109, %107, %111 : vector<128x128xi1>, vector<128x128xf32>
    %c19 = arith.constant 19 : index
    %c0_58 = arith.constant 0 : index
    %113 = vector.load %arg2[%c19, %c0_58] : memref<24x128xf32, #tpu.memory_space<vmem>>, vector<1x128xf32>
    %114 = vector.broadcast %113 : vector<1x128xf32> to vector<128x128xf32>
    %115 = arith.mulf %65, %114 : vector<128x128xf32>
    %c20 = arith.constant 20 : index
    %c0_59 = arith.constant 0 : index
    %116 = vector.load %arg2[%c20, %c0_59] : memref<24x128xf32, #tpu.memory_space<vmem>>, vector<1x128xf32>
    %117 = vector.broadcast %116 : vector<1x128xf32> to vector<128x128xf32>
    %118 = arith.addf %115, %117 : vector<128x128xf32>
    %c21 = arith.constant 21 : index
    %c0_60 = arith.constant 0 : index
    %119 = vector.load %arg2[%c21, %c0_60] : memref<24x128xf32, #tpu.memory_space<vmem>>, vector<1x128xf32>
    %120 = vector.broadcast %119 : vector<1x128xf32> to vector<128x128xf32>
    %121 = arith.mulf %112, %120 : vector<128x128xf32>
    %c22 = arith.constant 22 : index
    %c0_61 = arith.constant 0 : index
    %122 = vector.load %arg2[%c22, %c0_61] : memref<24x128xf32, #tpu.memory_space<vmem>>, vector<1x128xf32>
    %123 = vector.broadcast %122 : vector<1x128xf32> to vector<128x128xf32>
    %124 = arith.addf %121, %123 : vector<128x128xf32>
    %125 = arith.truncf %118 : vector<128x128xf32> to vector<128x128xbf16>
    %c7_62 = arith.constant 7 : index
    %c0_63 = arith.constant 0 : index
    %c0_64 = arith.constant 0 : index
    %126 = vector.load %arg3[%c7_62, %c0_63, %c0_64] : memref<9x128x128xbf16, #tpu.memory_space<vmem>>, vector<1x128x128xbf16>
    %127 = vector.shape_cast %126 : vector<1x128x128xbf16> to vector<128x128xbf16>
    %cst_65 = arith.constant dense<0.000000e+00> : vector<128x128xf32>
    %128 = tpu.matmul %125, %127, %cst_65 {dimension_numbers = #tpu.dot_dimension_numbers<[1], [0], [0], [1], [0, 0, 1, 1], [], []>} : vector<128x128xbf16>, vector<128x128xbf16>, vector<128x128xf32> -> vector<128x128xf32>
    %129 = arith.truncf %124 : vector<128x128xf32> to vector<128x128xbf16>
    %c8_66 = arith.constant 8 : index
    %c0_67 = arith.constant 0 : index
    %c0_68 = arith.constant 0 : index
    %130 = vector.load %arg3[%c8_66, %c0_67, %c0_68] : memref<9x128x128xbf16, #tpu.memory_space<vmem>>, vector<1x128x128xbf16>
    %131 = vector.shape_cast %130 : vector<1x128x128xbf16> to vector<128x128xbf16>
    %cst_69 = arith.constant dense<0.000000e+00> : vector<128x128xf32>
    %132 = tpu.matmul %129, %131, %cst_69 {dimension_numbers = #tpu.dot_dimension_numbers<[1], [0], [0], [1], [0, 0, 1, 1], [], []>} : vector<128x128xbf16>, vector<128x128xbf16>, vector<128x128xf32> -> vector<128x128xf32>
    %133 = arith.addf %128, %132 : vector<128x128xf32>
    %c23 = arith.constant 23 : index
    %c0_70 = arith.constant 0 : index
    %134 = vector.load %arg2[%c23, %c0_70] : memref<24x128xf32, #tpu.memory_space<vmem>>, vector<1x128xf32>
    %135 = vector.broadcast %134 : vector<1x128xf32> to vector<128x128xf32>
    %136 = arith.addf %133, %135 : vector<128x128xf32>
    %c0_71 = arith.constant 0 : index
    %c0_72 = arith.constant 0 : index
    %137 = vector.load %arg4[%c0_71, %c0_72] : memref<128x128xf32, #tpu.memory_space<vmem>>, vector<128x128xf32>
    tpu.vector_store %arg4[%c0_71, %c0_72], %136 {strides = array<i32>} : memref<128x128xf32, #tpu.memory_space<vmem>>, vector<128x128xf32>,
    return
  }
  func.func @transform_0(%arg0: i32) -> (i32, i32) {
    %c0_i32 = arith.constant 0 : i32
    %c0_i32_0 = arith.constant 0 : i32
    return %arg0, %c0_i32 : i32, i32
  }
  func.func @transform_1(%arg0: i32) -> (i32, i32) {
    %c0_i32 = arith.constant 0 : i32
    %c0_i32_0 = arith.constant 0 : i32
    %c0_i32_1 = arith.constant 0 : i32
    return %c0_i32, %c0_i32_0 : i32, i32
  }
  func.func @transform_2(%arg0: i32) -> (i32, i32, i32) {
    %c0_i32 = arith.constant 0 : i32
    %c0_i32_0 = arith.constant 0 : i32
    %c0_i32_1 = arith.constant 0 : i32
    %c0_i32_2 = arith.constant 0 : i32
    return %c0_i32, %c0_i32_0, %c0_i32_1 : i32, i32, i32
  }
  func.func @transform_3(%arg0: i32) -> (i32, i32) {
    %c0_i32 = arith.constant 0 : i32
    %c0_i32_0 = arith.constant 0 : i32
    return %arg0, %c0_i32 : i32, i32
  }
}

</mosaic_0001>

<bundles_post_ra>
// kernel: tpu_custom_call.1
= control target key start
LH: loop header
LB: loop body
LE: loop exit
PB: predicated region body
PF: predicated region fallthrough
CT: control target
= control target key end

     0   :  { %8 = vsyncpa [#allocation3], 0  ;;  %s4408_s0 = inlined_call_operand.hbm [shape: f32[256,128], index: 0, kind: input, shape index: {}]   ;;  %s4409_s1 = inlined_call_operand.hbm [shape: f32[24,128], index: 1, kind: input, shape index: {}]   ;;  %s4410_s2 = inlined_call_operand.hbm [shape: bf16[9,128,128], index: 2, kind: input, shape index: {}]   ;;  %s4411_s3 = inlined_call_operand.hbm [shape: f32[256,128], index: 3, kind: output, shape index: {}]  }
   0x1   :  { %10 = vsyncpa [#allocation3 + $0x1], 0 }
   0x2   :  { %11 = vsyncpa [#allocation6], 0 }
   0x3   :  { %12 = vsyncpa [#allocation4], 0 }
   0x4   :  { %14 = vsyncpa [#allocation4 + $0x1], 0  ;;  %s3473_s12 = smov 0   ;;  %s3475_s13 = smov 0  }
   0x5   :  { %s3477_s14 = smov 0   ;;  %s3479_s15 = smov 0  }
   0x6 LB: > { %s3494_s16 = sadd.s32 4294967295, %s3441_s15   ;;  %s2584_s17 = sadd.s32 4294967294, %s3441_s15   ;;  %s3441_s15 = sphi %s3479_s15, %s4432_s15   ;;  %s3437_s14 = sphi %s3477_s14, %s4431_s14   ;;  %s3433_s13 = sphi %s3475_s13, %s4430_s13   ;;  %s3429_s12 = sphi %s3473_s12, %s4429_s12  }
   0x7   : > { %p40_p0 = scmp.ne.s32.totalorder %s3433_s13, %s3429_s12  ;;  %p4412_p1 = scmp.eq.s32.totalorder %s3494_s16, 0 }
   0x8   : > { %p106_p2 = scmp.eq.s32.totalorder %s3494_s16, 1  ;;  %p112_p3 = scmp.eq.s32.totalorder %s2584_s17, 1 }
   0x9   : > { %p3503_p4 = por %p4412_p1, %p40_p0  ;;  %p2585_p5 = scmp.ge.s32.totalorder %s3441_s15, 1 }
   0xa   : > { %p3508_p6 = por %p112_p3, %p40_p0  ;;  %p119_p7 = scmp.lt.s32.totalorder %s3441_s15, 3 }
   0xb   : > { %s4416_s18 = scalar_select %p3503_p4, 1, 0 }
   0xc   : > { %s4417_s19 = scalar_select %p3508_p6, 1, 0 }
   0xd   : > { %p3513_p8 = pnand %p2585_p5, %p119_p7  ;;  %s3443_s21 = smov [#allocation5]  }
   0xe   : > { %s131_s22 = sshll.u32 %s3443_s21, 4  ;;  %s3444_s24 = smov [#allocation7]   ;;  %s132_s22 = int_to_ptr.vmem [resolvable:$true] %s131_s22 }
   0xf   : > { %s4418_s20 = scalar_select %p3513_p8, 1, 0 }
  0x10   : > { %p3160_p9 = pneg %p3513_p8  ;;  %s144_s25 = sshll.u32 %s3444_s24, 4  ;;  %s145_s25 = int_to_ptr.vmem [resolvable:$true] %s144_s25 }
  0x11   : > { %s3304_s26 = scalar_lea.vmem %s132_s22, 384  ;;  %p3312_p5 = scmp.lt.s32.totalorder %s132_s22, %s132_s22 }
  0x12   : > { %p3522_p11 = pnand %p3160_p9, %p4412_p1  ;;  %p3305_p13 = scmp.ne.s32.totalorder %s132_s22, %s3304_s26 }
  0x13   : > { %p3313_p7 = scmp.lt.s32.totalorder %s3304_s26, %s3304_s26 }
  0x14   : > { %p3295_p12 = pneg %p3522_p11 }
  0x15   : > { %p3314_p10 = por %p3313_p7, %p3312_p5 }
  0x16   : > { %p3307_p0 = pnand %p3305_p13, %p3295_p12 }
  0x18   : > { %p3308_p3 = pneg %p3307_p0 }
  0x1a   : > { %p3315_p9 = pnand %p3314_p10, %p3308_p3 }
  0x1c   : > { %3318 = shalt.err (!%p3315_p9)
}
  0x1d   : > { %s3445_s27 = smov 128   ;;  %s3446_s28 = smov 8  }
  0x1e   : > { %3163 = dma.hbm_to_vmem [thread:$0]  (!%p3522_p11), %s4409_s1, 384, %s132_s22, [#allocation6], %s3445_s27, %s3445_s27, %s3446_s28  }
  0x1f   : > { %s3330_s4 = scalar_lea.vmem %s145_s25, 9216  ;;  %p3338_p10 = scmp.lt.s32.totalorder %s145_s25, %s145_s25 }
  0x20   : > { %p3331_p13 = scmp.ne.s32.totalorder %s145_s25, %s3330_s4  ;;  %p3339_p3 = scmp.lt.s32.totalorder %s3330_s4, %s3330_s4 }
  0x22   : > { %p3333_p0 = pnand %p3331_p13, %p3295_p12  ;;  %p3340_p7 = por %p3339_p3, %p3338_p10 }
  0x24   : > { %p3334_p5 = pneg %p3333_p0 }
  0x26   : > { %p3341_p9 = pnand %p3340_p7, %p3334_p5 }
  0x28   : > { %3344 = shalt.err (!%p3341_p9)
}
  0x29   : > { %s3447_s5 = smov 64   ;;  %s3448_s6 = smov 4  }
  0x2a   : > { %3166 = dma.hbm_to_vmem [thread:$0]  (!%p3522_p11), %s4410_s2, 9216, %s145_s25, [#allocation6], %s3447_s5, %s3447_s5, %s3448_s6  }
  0x2b   : > { %s3548_s9 = sadd.s32 1, %s3441_s15   ;;  %s27_s11 = sadd.s32 1, %s3437_s14 }
  0x2c   : > { %s24_s10 = ssub.s32 %s3441_s15, %s3548_s9  ;;  %p34_p13 = scmp.ne.s32.totalorder %s3437_s14, %s3433_s13 }
  0x2d   : > { %p25_p12 = scmp.eq.s32.totalorder %s24_s10, 0  ;;  %p35_p0 = scmp.eq.s32.totalorder %s3441_s15, 0 }
  0x2e   : > { %p3561_p10 = por %p106_p2, %p34_p13  ;;  %p3177_p3 = scmp.lt.s32.totalorder %s3441_s15, 2 }
  0x2f   : > { %s3557_s17 = scalar_select %p25_p12, %s3437_s14, %s27_s11  }
  0x30   : > { %p36_p5 = por %p35_p0, %p34_p13  ;;  %s158_s22 = sand.u32 1, %s3437_s14  }
  0x31   : > { %s4420_s21 = scalar_select %p3561_p10, 1, 0 }
  0x32   : > { %s2589_s23 = sshll.u32 %s158_s22, 7  ;;  %s2698_s24 = sshll.u32 %s3441_s15, 11 }
  0x33   : > { %s3571_s29 = scalar_lea.hbm %s4408_s0, %s2698_s24  ;;  %s162_s30 = scalar_lea.vmem [#allocation2], %s2589_s23 }
  0x34   : > { %s169_s4 = sshll.u32 %s162_s30, 4  ;;  %p3575_p2 = pnand %p3177_p3, %p36_p5  ;;  %s3573_s4 = int_to_ptr.vmem [resolvable:$true] %s169_s4 }
  0x35   : > { %s3579_s6 = scalar_lea.sflag [#allocation3], %s158_s22  ;;  %s3345_s7 = scalar_lea.hbm %s3571_s29, 2048 }
  0x36   : > { %p3346_p11 = scmp.ne.s32.totalorder %s3571_s29, %s3345_s7  ;;  %p3347_p7 = pneg %p3575_p2 }
  0x37   : > { %s3350_s11 = scalar_lea.hbm %s4408_s0, 4096  ;;  %p3351_p13 = scmp.lt.s32.totalorder %s3571_s29, %s4408_s0 }
  0x38   : > { %p3348_p9 = pnand %p3347_p7, %p3346_p11  ;;  %p3352_p0 = scmp.lt.s32.totalorder %s3350_s11, %s3345_s7 }
  0x3a   : > { %p3349_p12 = pneg %p3348_p9  ;;  %p3353_p5 = por %p3352_p0, %p3351_p13 }
  0x3c   : > { %p3354_p3 = pnand %p3353_p5, %p3349_p12 }
  0x3e   : > { %3357 = shalt.err (!%p3354_p3)
}
  0x3f   : > { %s3358_s22 = scalar_lea.vmem %s3573_s4, 2048  ;;  %s3449_s25 = smov [#allocation2]  }
  0x40   : > { %p3359_p1 = scmp.ne.s32.totalorder %s3573_s4, %s3358_s22  ;;  %s3363_s26 = sshll.u32 %s3449_s25, 4  ;;  %s3364_s26 = int_to_ptr.vmem [resolvable:$false] %s3363_s26 }
  0x41   : > { %s3365_s30 = scalar_lea.vmem %s3364_s26, 4096  ;;  %p3366_p9 = scmp.lt.s32.totalorder %s3573_s4, %s3364_s26 }
  0x42   : > { %p3361_p6 = pnand %p3359_p1, %p3347_p7  ;;  %p3367_p10 = scmp.lt.s32.totalorder %s3365_s30, %s3358_s22 }
  0x44   : > { %p3362_p11 = pneg %p3361_p6  ;;  %p3368_p4 = por %p3367_p10, %p3366_p9 }
  0x46   : > { %p3369_p8 = pnand %p3368_p4, %p3362_p11 }
  0x48   : > { %3372 = shalt.err (!%p3369_p8)
}
  0x49   : > { %3170 = dma.hbm_to_vmem [thread:$0]  (!%p3575_p2), %s3571_s29, 2048, %s3573_s4, %s3579_s6, %s3445_s27, %s3445_s27, %s3446_s28  }
  0x4a   : > { %p4422_p1 = scmp.ne.s32.totalorder %s4418_s20, 0 }
  0x4b   : > { %s3606_s7 = sand.u32 (!%p4422_p1), 1, %s3433_s13   ;;  %p4423_p4 = scmp.ne.s32.totalorder (!%p4422_p1), %s4416_s18, 0 }
  0x4c   : > { %181 = sbr.rel (%p4422_p1) target bundleno = 1438 (0x59e), region = 32  ;;  %s2593_s8 = sshll.u32 (!%p4422_p1), %s3606_s7, 7 }
  0x4d   : > { %s184_s10 = scalar_lea.sflag (!%p4422_p1), [#allocation3], %s3606_s7  ;;  %s3612_s5 = scalar_lea.vmem (!%p4422_p1), [#allocation2], %s2593_s8 }
  0x51   : > { %3416 = dma.done.wait (%p4423_p4), %s184_s10, 2048  }
  0x52   : > { %3418 = vsyncadd (%p4423_p4), %s184_s10, 4294965248  ;;  %p4424_p6 = scmp.eq.s32.totalorder %s3494_s16, 0 }
  0x54   : > { %3420 = dma.done.wait (%p4424_p6), [#allocation6], 9600   ;;  %p4425_p8 = pmov %p4424_p6 }
  0x55   : > { %v3221_v0 = vld [vmem:[#allocation7 + $0x38] sm:$0xff]   ;;  %v3222_v1 = vld [vmem:[#allocation7 + $0x30] sm:$0xff]   ;;  %v3223_v2 = vld [vmem:[#allocation7 + $0x28] sm:$0xff]   ;;  %s4325_s18 = scalar_lea.vmem [#allocation8], %s2593_s8  ;;  %s2699_s20 = sshll.u32 %s3494_s16, 11 }
  0x56   : > { %3422 = vsyncadd (%p4425_p8), [#allocation6], 4294957696  ;;  %2844 = vmatprep.subr.bf16.mxu0 %v3221_v0  ;;  %v3224_v3 = vld [vmem:[#allocation7 + $0x20] sm:$0xff]   ;;  %v3623_v4 = vld [vmem:[%s3612_s5] sm:$0xff]  ;;  %s2492_s27 = sshll.u32 %s4325_s18, 4  ;;  %s4360_s4 = scalar_lea.hbm %s4411_s3, %s2699_s20  ;;  %s4362_s27 = int_to_ptr.vmem [resolvable:$true] %s2492_s27 }
  0x57   : > { %2845 = vmatpush3.bf16.msra.mxu0 %v3221_v0  ;;  %v3626_v5 = vld [vmem:[%s3612_s5 + $0x8] sm:$0xff]  ;;  %v3628_v6 = vld [vmem:[#allocation5] ss:$0 sm:$0xff]  ;;  %v3634_v9 = vld [vmem:[#allocation5 + $0x1] ss:$0 sm:$0xff]  ;;  %s2479_s16 = scalar_lea.sflag [#allocation4], %s3606_s7 }
  0x58   : > { %2846 = vmatprep.subr.bf16.mxu0 %v3222_v1  ;;  %v242_v7 = vmul.f32 %v3628_v6, %v3623_v4  ;;  %v243_v8 = vmul.f32 %v3628_v6, %v3626_v5  ;;  %v3225_v12 = vld [vmem:[#allocation7 + $0x18] sm:$0xff]   ;;  %v3226_v14 = vld [vmem:[#allocation7 + $0x10] sm:$0xff]   ;;  %v3642_v16 = vld [vmem:[%s3612_s5 + $0x18] sm:$0xff]  ;;  %s3373_s6 = scalar_lea.vmem %s4362_s27, 2048  ;;  %p4426_p2 = scmp.ne.s32.totalorder %s4420_s21, 0 }
  0x59   : > { %v3639_v15 = vld [vmem:[%s3612_s5 + $0x10] sm:$0xff]  ;;  %v3227_v18 = vld [vmem:[#allocation7 + $0x8] sm:$0xff]   ;;  %v3233_v20 = vld [vmem:[#allocation7 + $0xb0] sm:$0xff]   ;;  %v245_v23 = vmul.f32 %v3628_v6, %v3642_v16  ;;  %p3374_p10 = scmp.ne.s32.totalorder %s4362_s27, %s3373_s6  ;;  %s3450_s11 = smov [#allocation8]  }
  0x5a   : > { %v263_v10 = vadd.f32 %v3634_v9, %v242_v7  ;;  %v264_v11 = vadd.f32 %v3634_v9, %v243_v8  ;;  %v3231_v17 = vld [vmem:[#allocation7 + $0xb8] sm:$0xff]   ;;  %v3645_v19 = vld [vmem:[%s3612_s5 + $0x20] sm:$0xff]  ;;  %v3648_v21 = vld [vmem:[%s3612_s5 + $0x28] sm:$0xff]  ;;  %v244_v22 = vmul.f32 %v3628_v6, %v3639_v15  ;;  %s3377_s23 = sshll.u32 %s3450_s11, 4  ;;  %s3378_s23 = int_to_ptr.vmem [resolvable:$false] %s3377_s23 }
  0x5b   : > { %2847 = vmatpush3.bf16.msra.mxu0 %v3222_v1  ;;  %2876 = vmatprep.subr.bf16.mxu1 %v3231_v17  ;;  %v3235_v24 = vld [vmem:[#allocation7 + $0xa8] sm:$0xff]   ;;  %v3228_v25 = vld [vmem:[#allocation7] sm:$0xff]   ;;  %v246_v26 = vmul.f32 %v3628_v6, %v3645_v19  ;;  %v247_v27 = vmul.f32 %v3628_v6, %v3648_v21  ;;  %v3659_v29 = vld [vmem:[%s3612_s5 + $0x30] sm:$0xff]  ;;  %v266_v32 = vadd.f32 %v3634_v9, %v245_v23  ;;  %p3375_p7 = pnand %p3374_p10, %p4426_p2  ;;  %s3379_s24 = scalar_lea.vmem %s3378_s23, 4096 }
  0x5c   : > { %2848 = vmatprep.subr.bf16.mxu0 %v3223_v2  ;;  %v279_v13 = vpack.c.bf16 %v264_v11, %v263_v10  ;;  %2877 = vmatpush3.bf16.msra.mxu1 %v3231_v17  ;;  %v3237_v28 = vld [vmem:[#allocation7 + $0xa0] sm:$0xff]   ;;  %v265_v31 = vadd.f32 %v3634_v9, %v244_v22  ;;  %v3667_v33 = vld [vmem:[%s3612_s5 + $0x40] sm:$0xff]  ;;  %v3670_v34 = vld [vmem:[%s3612_s5 + $0x48] sm:$0xff]  ;;  %v248_v39 = vmul.f32 %v3628_v6, %v3659_v29  ;;  %p3380_p13 = scmp.lt.s32.totalorder %s4362_s27, %s3378_s23  ;;  %p3381_p0 = scmp.lt.s32.totalorder %s3379_s24, %s3373_s6 }
  0x5d   : > { %2878 = vmatprep.subr.bf16.mxu1 %v3233_v20  ;;  %v3662_v30 = vld [vmem:[%s3612_s5 + $0x38] sm:$0xff]  ;;  %v3229_v35 = vld [vmem:[#allocation7 + $0x78] sm:$0xff]   ;;  %v267_v36 = vadd.f32 %v3634_v9, %v246_v26  ;;  %v268_v37 = vadd.f32 %v3634_v9, %v247_v27  ;;  %v3230_v41 = vld [vmem:[#allocation7 + $0x70] sm:$0xff]   ;;  %v250_v43 = vmul.f32 %v3628_v6, %v3667_v33  ;;  %v251_v44 = vmul.f32 %v3628_v6, %v3670_v34  ;;  %p3376_p12 = pneg %p3375_p7 }
  0x5e   : > { %2860 = vmatprep.mubr.bf16.mxu0 %v279_v13  ;;  %v280_v38 = vpack.c.bf16 %v266_v32, %v265_v31  ;;  %v249_v40 = vmul.f32 %v3628_v6, %v3662_v30  ;;  %v3683_v45 = vld [vmem:[%s3612_s5 + $0x50] sm:$0xff]  ;;  %v3686_v46 = vld [vmem:[%s3612_s5 + $0x58] sm:$0xff]  ;;  %v269_v47 = vadd.f32 %v3634_v9, %v248_v39  ;;  %v3691_v49 = vld [vmem:[%s3612_s5 + $0x60] sm:$0xff]  ;;  %p3382_p5 = por %p3381_p0, %p3380_p13 }
  0x5f   : > { %2849 = vmatpush3.bf16.msra.mxu0 %v3223_v2  ;;  %v281_v42 = vpack.c.bf16 %v268_v37, %v267_v36  ;;  %v3694_v50 = vld [vmem:[%s3612_s5 + $0x68] sm:$0xff]  ;;  %v3232_v51 = vld [vmem:[#allocation7 + $0x68] sm:$0xff]   ;;  %v271_v52 = vadd.f32 %v3634_v9, %v250_v43  ;;  %v272_v53 = vadd.f32 %v3634_v9, %v251_v44  ;;  %v252_v55 = vmul.f32 %v3628_v6, %v3683_v45  ;;  %v3234_v57 = vld [vmem:[#allocation7 + $0x60] sm:$0xff]  }
  0x60   : > { %2850 = vmatprep.subr.bf16.mxu0 %v3224_v3  ;;  %2879 = vmatpush3.bf16.msra.mxu1 %v3233_v20  ;;  %v270_v48 = vadd.f32 %v3634_v9, %v249_v40  ;;  %v253_v56 = vmul.f32 %v3628_v6, %v3686_v46  ;;  %v254_v59 = vmul.f32 %v3628_v6, %v3691_v49  ;;  %v3707_v61 = vld [vmem:[%s3612_s5 + $0x70] sm:$0xff]  ;;  %v3710_v62 = vld [vmem:[%s3612_s5 + $0x78] sm:$0xff]  ;;  %v3238_v17 = vld [vmem:[#allocation7 + $0x50] sm:$0xff]   ;;  %p3383_p3 = pnand %p3382_p5, %p3376_p12 }
  0x61   : > { %2880 = vmatprep.subr.bf16.mxu1 %v3235_v24  ;;  %v283_v58 = vpack.c.bf16 %v272_v53, %v271_v52  ;;  %v255_v60 = vmul.f32 %v3628_v6, %v3694_v50  ;;  %v273_v63 = vadd.f32 %v3634_v9, %v252_v55  ;;  %v3236_v1 = vld [vmem:[#allocation7 + $0x58] sm:$0xff]   ;;  %v256_v8 = vmul.f32 %v3628_v6, %v3707_v61  ;;  %v3240_v23 = vld [vmem:[#allocation7 + $0x48] sm:$0xff]   ;;  %v3241_v26 = vld [vmem:[#allocation7 + $0x90] sm:$0xff]  }
  0x62   : > { %v282_v54 = vpack.c.bf16 %v270_v48, %v269_v47  ;;  %v274_v0 = vadd.f32 %v3634_v9, %v253_v56  ;;  %v275_v2 = vadd.f32 %v3634_v9, %v254_v59  ;;  %v257_v10 = vmul.f32 %v3628_v6, %v3710_v62  ;;  %v3239_v20 = vld [vmem:[#allocation7 + $0x98] sm:$0xff]   ;;  %v3242_v31 = vld [vmem:[#allocation7 + $0x40] sm:$0xff]  }
  0x63   : > { %2851 = vmatpush3.bf16.msra.mxu0 %v3224_v3  ;;  %v276_v3 = vadd.f32 %v3634_v9, %v255_v60 }
  0x64   : > { %2852 = vmatprep.subr.bf16.mxu0 %v3225_v12  ;;  %2881 = vmatpush3.bf16.msra.mxu1 %v3235_v24  ;;  %v284_v7 = vpack.c.bf16 %v274_v0, %v273_v63  ;;  %v278_v13 = vadd.f32 %v3634_v9, %v257_v10  ;;  %v3738_v0 = vld [vmem:[#allocation7 + $0xf8] sm:$0xff]  }
  0x65   : > { %2882 = vmatprep.subr.bf16.mxu1 %v3237_v28  ;;  %v285_v11 = vpack.c.bf16 %v276_v3, %v275_v2  ;;  %v3746_v3 = vld [vmem:[#allocation5 + $0xb] ss:$0 sm:$0xff] }
  0x67   : > { %2853 = vmatpush3.bf16.msra.mxu0 %v3225_v12  ;;  %v277_v12 = vadd.f32 %v3634_v9, %v256_v8  ;;  %v2609_v9 = vld [vmem:[#allocation5 + $0x4] ss:$0 sm:$0xff] }
  0x68   : > { %2854 = vmatprep.subr.bf16.mxu0 %v3226_v14  ;;  %2883 = vmatpush3.bf16.msra.mxu1 %v3237_v28 }
  0x69   : > { %2884 = vmatprep.subr.bf16.mxu1 %v3239_v20 }
  0x6b   : > { %2855 = vmatpush3.bf16.msra.mxu0 %v3226_v14  ;;  %v286_v14 = vpack.c.bf16 %v278_v13, %v277_v12 }
  0x6c   : > { %2856 = vmatprep.subr.bf16.mxu0 %v3227_v18  ;;  %2885 = vmatpush3.bf16.msra.mxu1 %v3239_v20 }
  0x6d   : > { %2886 = vmatprep.subr.bf16.mxu1 %v3241_v26 }
  0x6f   : > { %2857 = vmatpush3.bf16.msra.mxu0 %v3227_v18  ;;  %v2608_v18 = vld [vmem:[#allocation5 + $0x3] ss:$0 sm:$0xff] }
  0x70   : > { %2858 = vmatprep.subr.bf16.mxu0 %v3228_v25  ;;  %v508_v22 = vmul.f32 %v2608_v18, %v3639_v15  ;;  %v509_v6 = vmul.f32 %v2608_v18, %v3642_v16  ;;  %v506_v24 = vmul.f32 %v2608_v18, %v3623_v4  ;;  %2887 = vmatpush3.bf16.msra.mxu1 %v3241_v26  ;;  %v3243_v16 = vld [vmem:[#allocation7 + $0x88] sm:$0xff]  }
  0x71   : > { %2888 = vmatprep.subr.bf16.mxu1 %v3243_v16  ;;  %v510_v36 = vmul.f32 %v2608_v18, %v3645_v19  ;;  %v511_v37 = vmul.f32 %v2608_v18, %v3648_v21  ;;  %v513_v39 = vmul.f32 %v2608_v18, %v3662_v30  ;;  %v514_v48 = vmul.f32 %v2608_v18, %v3667_v33 }
  0x72   : > { %v529_v27 = vadd.f32 %v2609_v9, %v508_v22  ;;  %v530_v28 = vadd.f32 %v2609_v9, %v509_v6  ;;  %v527_v32 = vadd.f32 %v2609_v9, %v506_v24  ;;  %v516_v19 = vmul.f32 %v2608_v18, %v3683_v45 }
  0x73   : > { %2859 = vmatpush3.bf16.msra.mxu0 %v3228_v25  ;;  %v507_v25 = vmul.f32 %v2608_v18, %v3626_v5  ;;  %v3244_v5 = vld [vmem:[#allocation7 + $0x80] sm:$0xff]   ;;  %v531_v40 = vadd.f32 %v2609_v9, %v510_v36  ;;  %v534_v43 = vadd.f32 %v2609_v9, %v513_v39  ;;  %v517_v21 = vmul.f32 %v2608_v18, %v3686_v46 }
  0x74   : > { %2908 = vmatprep.subr.bf16.mxu0 %v3229_v35  ;;  %v586_v4 = vpack.c.bf16 %v530_v28, %v529_v27  ;;  %2889 = vmatpush3.bf16.msra.mxu1 %v3243_v16  ;;  %v535_v52 = vadd.f32 %v2609_v9, %v514_v48  ;;  %v537_v53 = vadd.f32 %v2609_v9, %v516_v19 }
  0x75   : > { %v528_v15 = vadd.f32 %v2609_v9, %v507_v25  ;;  %2890 = vmatprep.subr.bf16.mxu1 %v3244_v5  ;;  %v538_v30 = vadd.f32 %v2609_v9, %v517_v21  ;;  %v518_v56 = vmul.f32 %v2608_v18, %v3691_v49  ;;  %v520_v33 = vmul.f32 %v2608_v18, %v3707_v61  ;;  %v3744_v61 = vld [vmem:[#allocation5 + $0x5] ss:$0 sm:$0xff] }
  0x76   : > { %2861 = vmatmul.mubr.bf16.vlgmr.msra.gmra.mxu0 %v280_v38  ;;  %v512_v38 = vmul.f32 %v2608_v18, %v3659_v29 }
  0x77   : > { %2864 = vmatprep.mubr.bf16.mxu0 %v281_v42  ;;  %2909 = vmatpush3.bf16.msra.mxu0 %v3229_v35  ;;  %v585_v35 = vpack.c.bf16 %v528_v15, %v527_v32  ;;  %v590_v55 = vpack.c.bf16 %v538_v30, %v537_v53  ;;  %v541_v59 = vadd.f32 %v2609_v9, %v520_v33 }
  0x78   : > { %2910 = vmatprep.subr.bf16.mxu0 %v3230_v41  ;;  %2891 = vmatpush3.bf16.msra.mxu1 %v3244_v5  ;;  %v533_v42 = vadd.f32 %v2609_v9, %v512_v38 }
  0x79   : > { %2940 = vmatprep.subr.bf16.mxu1 %v3738_v0 }
  0x7a   : > { %v588_v47 = vpack.c.bf16 %v534_v43, %v533_v42 }
  0x7b   : > { %2911 = vmatpush3.bf16.msra.mxu0 %v3230_v41  ;;  %v532_v41 = vadd.f32 %v2609_v9, %v511_v37 }
  0x7c   : > { %2912 = vmatprep.subr.bf16.mxu0 %v3232_v51 }
  0x7d   : > { %v587_v44 = vpack.c.bf16 %v532_v41, %v531_v40 }
  0x7e   : > { %2865 = vmatmul.mubr.bf16.gmra.mxu0 %v282_v54 }
  0x7f   : > { %2868 = vmatprep.mubr.bf16.mxu0 %v283_v58  ;;  %2913 = vmatpush3.bf16.msra.mxu0 %v3232_v51  ;;  %v515_v51 = vmul.f32 %v2608_v18, %v3670_v34  ;;  %v521_v34 = vmul.f32 %v2608_v18, %v3710_v62  ;;  %v539_v58 = vadd.f32 %v2609_v9, %v518_v56 }
  0x80   : > { %2914 = vmatprep.subr.bf16.mxu0 %v3234_v57 }
  0x81   : > { %v536_v29 = vadd.f32 %v2609_v9, %v515_v51  ;;  %v542_v46 = vadd.f32 %v2609_v9, %v521_v34 }
  0x83   : > { %2915 = vmatpush3.bf16.msra.mxu0 %v3234_v57  ;;  %v589_v54 = vpack.c.bf16 %v536_v29, %v535_v52  ;;  %v519_v57 = vmul.f32 %v2608_v18, %v3694_v50  ;;  %v592_v63 = vpack.c.bf16 %v542_v46, %v541_v59 }
  0x84   : > { %2916 = vmatprep.subr.bf16.mxu0 %v3236_v1 }
  0x85   : > { %v540_v45 = vadd.f32 %v2609_v9, %v519_v57 }
  0x86   : > { %2869 = vmatmul.mubr.bf16.gmra.mxu0 %v284_v7 }
  0x87   : > { %2872 = vmatprep.mubr.bf16.mxu0 %v285_v11  ;;  %2917 = vmatpush3.bf16.msra.mxu0 %v3236_v1  ;;  %v591_v60 = vpack.c.bf16 %v540_v45, %v539_v58  ;;  %v3741_v1 = vld [vmem:[#allocation5 + $0x2] ss:$0 sm:$0xff]  ;;  %v3749_v11 = vld [vmem:[#allocation5 + $0xc] ss:$0 sm:$0xff] }
  0x88   : > { %2918 = vmatprep.subr.bf16.mxu0 %v3238_v17  ;;  %v3246_v45 = vld [vmem:[#allocation7 + $0xf0] sm:$0xff]  }
  0x8b   : > { %2919 = vmatpush3.bf16.msra.mxu0 %v3238_v17 }
  0x8c   : > { %2920 = vmatprep.subr.bf16.mxu0 %v3240_v23 }
  0x8e   : > { %2873 = vmatmul.mubr.bf16.gmra.mxu0 %v286_v14 }
  0x8f   : > { %2921 = vmatpush3.bf16.msra.mxu0 %v3240_v23  ;;  %2924 = vmatprep.mubr.bf16.mxu0 %v585_v35  ;;  %v3755_v23 = vld [vmem:[#allocation5 + $0x6] ss:$0 sm:$0xff] }
  0x90   : > { %2922 = vmatprep.subr.bf16.mxu0 %v3242_v31 }
  0x93   : > { %2923 = vmatpush3.bf16.msra.mxu0 %v3242_v31 }
  0x96   : > { %2925 = vmatmul.mubr.bf16.vlgmr.msra.gmra.mxu0 %v586_v4 }
  0x97   : > { %2928 = vmatprep.mubr.bf16.mxu0 %v587_v44 }
  0x9e   : > { %2929 = vmatmul.mubr.bf16.gmra.mxu0 %v588_v47 }
  0x9f   : > { %2932 = vmatprep.mubr.bf16.mxu0 %v589_v54 }
  0xa6   : > { %2933 = vmatmul.mubr.bf16.gmra.mxu0 %v590_v55 }
  0xa7   : > { %2936 = vmatprep.mubr.bf16.mxu0 %v591_v60 }
  0xae   : > { %2937 = vmatmul.mubr.bf16.gmra.mxu0 %v592_v63 }
 0x136   : > { %v2862_v49 = vpop.f32.mrf.mxu0 }
 0x137   : > { %v399_v50 = vadd.f32 %v2862_v49, %v3741_v1 }
 0x138   : > { %v390_v62 = vpop.f32.mrf.mxu0 }
 0x139   : > { %vm455_vm0 = vcmp.gt.f32.partialorder %v399_v50, 0.0  ;;  %v471_v2 = vmul.f32 0.01, %v399_v50  ;;  %v391_v7 = vadd.f32 %v3741_v1, %v390_v62 }
 0x13a   : > { %v2863_v8 = vpop.f32.mrf.mxu0 }
 0x13b   : > { %v487_v10 = vsel %vm455_vm0, %v399_v50, %v471_v2  ;;  %vm453_vm1 = vcmp.gt.f32.partialorder %v391_v7, 0.0  ;;  %v469_v12 = vmul.f32 0.01, %v391_v7  ;;  %v402_v13 = vadd.f32 %v2863_v8, %v3741_v1 }
 0x13c   : > { %v550_v14 = vmul.f32 %v3744_v61, %v487_v10  ;;  %v1266_v17 = vmul.f32 %v3746_v3, %v487_v10  ;;  %v393_v18 = vpop.f32.mrf.mxu0 }
 0x13d   : > { %vm456_vm2 = vcmp.gt.f32.partialorder %v402_v13, 0.0  ;;  %v472_v20 = vmul.f32 0.01, %v402_v13  ;;  %v394_v22 = vadd.f32 %v3741_v1, %v393_v18  ;;  %v485_v6 = vsel %vm453_vm1, %v391_v7, %v469_v12 }
 0x13e   : > { %v3758_v24 = vadd.f32 %v3749_v11, %v1266_v17  ;;  %v2866_v25 = vpop.f32.mrf.mxu0  ;;  %v548_v9 = vmul.f32 %v3744_v61, %v485_v6  ;;  %v1264_v16 = vmul.f32 %v3746_v3, %v485_v6  ;;  %v571_v35 = vadd.f32 %v3755_v23, %v550_v14 }
 0x13f   : > { %v488_v26 = vsel %vm456_vm2, %v402_v13, %v472_v20  ;;  %vm454_vm3 = vcmp.gt.f32.partialorder %v394_v22, 0.0  ;;  %v470_v27 = vmul.f32 0.01, %v394_v22  ;;  %v415_v28 = vadd.f32 %v2866_v25, %v3741_v1  ;;  %v3247_v20 = vld [vmem:[#allocation7 + $0xe8] sm:$0xff]  }
 0x140   : > { %v551_v31 = vmul.f32 %v3744_v61, %v488_v26  ;;  %v1267_v32 = vmul.f32 %v3746_v3, %v488_v26  ;;  %v406_v15 = vpop.f32.mrf.mxu0  ;;  %v569_v40 = vadd.f32 %v3755_v23, %v548_v9  ;;  %v3779_v21 = vadd.f32 %v3749_v11, %v1264_v16 }
 0x141   : > { %vm459_vm4 = vcmp.gt.f32.partialorder %v415_v28, 0.0  ;;  %v475_v4 = vmul.f32 0.01, %v415_v28  ;;  %v407_v5 = vadd.f32 %v3741_v1, %v406_v15  ;;  %v486_v36 = vsel %vm454_vm3, %v394_v22, %v470_v27 }
 0x142   : > { %v3768_v37 = vadd.f32 %v3749_v11, %v1267_v32  ;;  %v2867_v38 = vpop.f32.mrf.mxu0  ;;  %v549_v39 = vmul.f32 %v3744_v61, %v486_v36  ;;  %v572_v41 = vadd.f32 %v3755_v23, %v551_v31  ;;  %v1265_v19 = vmul.f32 %v3746_v3, %v486_v36 }
 0x143   : > { %v491_v42 = vsel %vm459_vm4, %v415_v28, %v475_v4  ;;  %vm457_vm5 = vcmp.gt.f32.partialorder %v407_v5, 0.0  ;;  %v473_v43 = vmul.f32 0.01, %v407_v5  ;;  %v418_v44 = vadd.f32 %v2867_v38, %v3741_v1 }
 0x144   : > { %v1344_v47 = vpack.c.bf16 %v3768_v37, %v3758_v24  ;;  %v409_v48 = vpop.f32.mrf.mxu0  ;;  %v570_v51 = vadd.f32 %v3755_v23, %v549_v39  ;;  %v554_v30 = vmul.f32 %v3744_v61, %v491_v42  ;;  %v611_v57 = vpack.c.bf16 %v572_v41, %v571_v35  ;;  %v3265_v24 = vld [vmem:[#allocation7 + $0x158] sm:$0xff]   ;;  %v3266_v37 = vld [vmem:[#allocation7 + $0x150] sm:$0xff]  }
 0x145   : > { %v489_v52 = vsel %vm457_vm5, %v407_v5, %v473_v43  ;;  %vm460_vm6 = vcmp.gt.f32.partialorder %v418_v44, 0.0  ;;  %v476_v29 = vmul.f32 0.01, %v418_v44  ;;  %v410_v53 = vadd.f32 %v3741_v1, %v409_v48 }
 0x146   : > { %v552_v54 = vmul.f32 %v3744_v61, %v489_v52  ;;  %v2870_v55 = vpop.f32.mrf.mxu0  ;;  %v610_v56 = vpack.c.bf16 %v570_v51, %v569_v40  ;;  %v3786_v59 = vmul.f32 %v3746_v3, %v491_v42  ;;  %v3789_v46 = vmul.f32 %v3746_v3, %v489_v52 }
 0x147   : > { %v492_v33 = vsel %vm460_vm6, %v418_v44, %v476_v29  ;;  %vm458_vm7 = vcmp.gt.f32.partialorder %v410_v53, 0.0  ;;  %v474_v34 = vmul.f32 0.01, %v410_v53  ;;  %v431_v58 = vadd.f32 %v2870_v55, %v3741_v1 }
 0x148   : > { %v555_v60 = vmul.f32 %v3744_v61, %v492_v33  ;;  %v3793_v63 = vmul.f32 %v3746_v3, %v492_v33  ;;  %v422_v49 = vpop.f32.mrf.mxu0  ;;  %2892 = vmatprep.mubr.bf16.mxu1 %v610_v56  ;;  %v573_v10 = vadd.f32 %v3755_v23, %v552_v54  ;;  %v575_v12 = vadd.f32 %v3755_v23, %v554_v30 }
 0x149   : > { %v490_v50 = vsel %vm458_vm7, %v410_v53, %v474_v34  ;;  %vm463_vm8 = vcmp.gt.f32.partialorder %v431_v58, 0.0  ;;  %v479_v62 = vmul.f32 0.01, %v431_v58  ;;  %v423_v2 = vadd.f32 %v3741_v1, %v422_v49  ;;  %2893 = vmatmul.mubr.bf16.vlgmr.msra.gmra.mxu1 %v611_v57 }
 0x14a   : > { %v553_v7 = vmul.f32 %v3744_v61, %v490_v50  ;;  %v2871_v8 = vpop.f32.mrf.mxu0  ;;  %v576_v13 = vadd.f32 %v3755_v23, %v555_v60  ;;  %2941 = vmatpush3.bf16.msra.mxu1 %v3738_v0  ;;  %v1269_v22 = vmul.f32 %v3746_v3, %v490_v50  ;;  %v3806_v26 = vadd.f32 %v3749_v11, %v1265_v19 }
 0x14b   : > { %v495_v14 = vsel %vm463_vm8, %v431_v58, %v479_v62  ;;  %vm461_vm9 = vcmp.gt.f32.partialorder %v423_v2, 0.0  ;;  %v477_v17 = vmul.f32 0.01, %v423_v2  ;;  %v434_v18 = vadd.f32 %v2871_v8, %v3741_v1  ;;  %2942 = vmatprep.subr.bf16.mxu1 %v3246_v45 }
 0x14c   : > { %v558_v6 = vmul.f32 %v3744_v61, %v495_v14  ;;  %v425_v25 = vpop.f32.mrf.mxu0  ;;  %v574_v9 = vadd.f32 %v3755_v23, %v553_v7  ;;  %v3810_v31 = vmul.f32 %v3746_v3, %v495_v14  ;;  %v613_v35 = vpack.c.bf16 %v576_v13, %v575_v12 }
 0x14d   : > { %v493_v27 = vsel %vm461_vm9, %v423_v2, %v477_v17  ;;  %vm464_vm10 = vcmp.gt.f32.partialorder %v434_v18, 0.0  ;;  %v480_v0 = vmul.f32 0.01, %v434_v18  ;;  %v426_v28 = vadd.f32 %v3741_v1, %v425_v25 }
 0x14e   : > { %v556_v32 = vmul.f32 %v3744_v61, %v493_v27  ;;  %v2874_v15 = vpop.f32.mrf.mxu0  ;;  %v612_v16 = vpack.c.bf16 %v574_v9, %v573_v10  ;;  %2943 = vmatpush3.bf16.msra.mxu1 %v3246_v45  ;;  %v1272_v38 = vmul.f32 %v3746_v3, %v493_v27  ;;  %v579_v41 = vadd.f32 %v3755_v23, %v558_v6 }
 0x14f   : > { %v496_v4 = vsel %vm464_vm10, %v434_v18, %v480_v0  ;;  %vm462_vm11 = vcmp.gt.f32.partialorder %v426_v28, 0.0  ;;  %v478_v5 = vmul.f32 0.01, %v426_v28  ;;  %v447_v36 = vadd.f32 %v2874_v15, %v3741_v1  ;;  %2944 = vmatprep.subr.bf16.mxu1 %v3247_v20 }
 0x150   : > { %v559_v39 = vmul.f32 %v3744_v61, %v496_v4  ;;  %v438_v40 = vpop.f32.mrf.mxu0  ;;  %2896 = vmatprep.mubr.bf16.mxu1 %v612_v16  ;;  %v1343_v42 = vpack.c.bf16 %v3806_v26, %v3779_v21  ;;  %v1275_v51 = vmul.f32 %v3746_v3, %v496_v4  ;;  %v577_v29 = vadd.f32 %v3755_v23, %v556_v32  ;;  %v3268_v21 = vld [vmem:[#allocation7 + $0x140] sm:$0xff]   ;;  %v3976_v26 = vld [vmem:[#allocation7 + $0x1b8] sm:$0xff]  }
 0x151   : > { %v494_v43 = vsel %vm462_vm11, %v426_v28, %v478_v5  ;;  %vm467_vm12 = vcmp.gt.f32.partialorder %v447_v36, 0.0  ;;  %v483_v44 = vmul.f32 0.01, %v447_v36  ;;  %v439_v48 = vadd.f32 %v3741_v1, %v438_v40  ;;  %2897 = vmatmul.mubr.bf16.gmra.mxu1 %v613_v35  ;;  %v3249_v40 = vld [vmem:[#allocation7 + $0xd8] sm:$0xff]  }
 0x152   : > { %v557_v19 = vmul.f32 %v3744_v61, %v494_v43  ;;  %v2875_v52 = vpop.f32.mrf.mxu0  ;;  %v580_v53 = vadd.f32 %v3755_v23, %v559_v39  ;;  %2945 = vmatpush3.bf16.msra.mxu1 %v3247_v20  ;;  %v1273_v56 = vmul.f32 %v3746_v3, %v494_v43  ;;  %v3830_v58 = vadd.f32 %v3749_v11, %v3789_v46  ;;  %v3252_v43 = vld [vmem:[#allocation7 + $0xc0] sm:$0xff]  }
 0x153   : > { %v499_v30 = vsel %vm467_vm12, %v447_v36, %v483_v44  ;;  %vm465_vm13 = vcmp.gt.f32.partialorder %v439_v48, 0.0  ;;  %v481_v54 = vmul.f32 0.01, %v439_v48  ;;  %v450_v55 = vadd.f32 %v2875_v52, %v3741_v1  ;;  %v3892_v44 = vld [vmem:[#allocation7 + $0x138] sm:$0xff]   ;;  %v3264_v52 = vld [vmem:[#allocation7 + $0x160] sm:$0xff]  }
 0x154   : > { %v562_v57 = vmul.f32 %v3744_v61, %v499_v30  ;;  %v441_v33 = vpop.f32.mrf.mxu0  ;;  %v578_v34 = vadd.f32 %v3755_v23, %v557_v19  ;;  %v1278_v50 = vmul.f32 %v3746_v3, %v499_v30  ;;  %v615_v7 = vpack.c.bf16 %v580_v53, %v579_v41  ;;  %v3250_v41 = vld [vmem:[#allocation7 + $0xd0] sm:$0xff]   ;;  %v3263_v19 = vld [vmem:[#allocation7 + $0x168] sm:$0xff]  }
 0x155   : > { %v497_v45 = vsel %vm465_vm13, %v439_v48, %v481_v54  ;;  %vm468_vm14 = vcmp.gt.f32.partialorder %v450_v55, 0.0  ;;  %v484_v60 = vmul.f32 0.01, %v450_v55  ;;  %v442_v49 = vadd.f32 %v3741_v1, %v441_v33  ;;  %v3261_v48 = vld [vmem:[#allocation7 + $0x178] sm:$0xff]  }
 0x156   : > { %v560_v62 = vmul.f32 %v3744_v61, %v497_v45  ;;  %v614_v2 = vpack.c.bf16 %v578_v34, %v577_v29  ;;  %v3836_v12 = vadd.f32 %v3749_v11, %v1269_v22  ;;  %v1276_v46 = vmul.f32 %v3746_v3, %v497_v45  ;;  %2972 = vmatprep.subr.bf16.mxu0 %v3261_v48  ;;  %v2926_v29 = vpop.f32.mrf.mxu0  ;;  %v3895_v45 = vld [vmem:[#allocation5 + $0x7] ss:$0 sm:$0xff] }
 0x157   : > { %v500_v8 = vsel %vm468_vm14, %v450_v55, %v484_v60  ;;  %vm466_vm15 = vcmp.gt.f32.partialorder %v442_v49, 0.0  ;;  %v482_v10 = vmul.f32 0.01, %v442_v49  ;;  %v3846_v20 = vadd.f32 %v3749_v11, %v3786_v59  ;;  %2973 = vmatpush3.bf16.msra.mxu0 %v3261_v48 }
 0x158   : > { %v563_v13 = vmul.f32 %v3744_v61, %v500_v8  ;;  %v1279_v14 = vmul.f32 %v3746_v3, %v500_v8  ;;  %2900 = vmatprep.mubr.bf16.mxu1 %v614_v2  ;;  %v581_v1 = vadd.f32 %v3755_v23, %v560_v62  ;;  %v1345_v18 = vpack.c.bf16 %v3836_v12, %v3830_v58  ;;  %v862_v53 = vpop.f32.mrf.mxu0 }
 0x159   : > { %v498_v17 = vsel %vm466_vm15, %v442_v49, %v482_v10  ;;  %2901 = vmatmul.mubr.bf16.gmra.mxu1 %v615_v7  ;;  %v3850_v22 = vadd.f32 %v3749_v11, %v3793_v63  ;;  %v3855_v9 = vadd.f32 %v3749_v11, %v1272_v38  ;;  %v3858_v27 = vadd.f32 %v3749_v11, %v1273_v56 }
 0x15a   : > { %v561_v6 = vmul.f32 %v3744_v61, %v498_v17  ;;  %v1277_v25 = vmul.f32 %v3746_v3, %v498_v17  ;;  %v584_v0 = vadd.f32 %v3755_v23, %v563_v13  ;;  %v3865_v28 = vadd.f32 %v3749_v11, %v3810_v31  ;;  %v2927_v30 = vpop.f32.mrf.mxu0 }
 0x15b   : > { %v1346_v59 = vpack.c.bf16 %v3850_v22, %v3846_v20  ;;  %v3868_v63 = vadd.f32 %v3749_v11, %v1275_v51  ;;  %v1347_v3 = vpack.c.bf16 %v3858_v27, %v3855_v9  ;;  %v3874_v32 = vadd.f32 %v3749_v11, %v1276_v46  ;;  %v3262_v51 = vld [vmem:[#allocation7 + $0x170] sm:$0xff]  }
 0x15c   : > { %v582_v61 = vadd.f32 %v3755_v23, %v561_v6  ;;  %v3877_v15 = vadd.f32 %v3749_v11, %v1277_v25  ;;  %v583_v16 = vadd.f32 %v3755_v23, %v562_v57  ;;  %v3883_v35 = vadd.f32 %v3749_v11, %v1278_v50  ;;  %v3248_v23 = vld [vmem:[#allocation7 + $0xe0] sm:$0xff]   ;;  %2974 = vmatprep.subr.bf16.mxu0 %v3262_v51  ;;  %v865_v54 = vpop.f32.mrf.mxu0  ;;  %v3982_v22 = vld [vmem:[#allocation5 + $0xd] ss:$0 sm:$0xff]  ;;  %v3985_v27 = vld [vmem:[#allocation5 + $0xe] ss:$0 sm:$0xff] }
 0x15d   : > { %v1348_v31 = vpack.c.bf16 %v3868_v63, %v3865_v28  ;;  %v3886_v4 = vadd.f32 %v3749_v11, %v1279_v14  ;;  %2946 = vmatprep.subr.bf16.mxu1 %v3248_v23  ;;  %v3251_v11 = vld [vmem:[#allocation7 + $0xc8] sm:$0xff]   ;;  %2975 = vmatpush3.bf16.msra.mxu0 %v3262_v51  ;;  %v3987_v63 = vld [vmem:[#allocation5 + $0x13] ss:$0 sm:$0xff] }
 0x15e   : > { %v616_v5 = vpack.c.bf16 %v582_v61, %v581_v1  ;;  %v1349_v36 = vpack.c.bf16 %v3877_v15, %v3874_v32  ;;  %v617_v38 = vpack.c.bf16 %v584_v0, %v583_v16  ;;  %2947 = vmatpush3.bf16.msra.mxu1 %v3248_v23  ;;  %2976 = vmatprep.subr.bf16.mxu0 %v3263_v19  ;;  %v2930_v55 = vpop.f32.mrf.mxu0  ;;  %v3900_v61 = vld [vmem:[#allocation5 + $0x8] ss:$0 sm:$0xff] }
 0x15f   : > { %v1350_v39 = vpack.c.bf16 %v3886_v4, %v3883_v35  ;;  %2948 = vmatprep.subr.bf16.mxu1 %v3249_v40 }
 0x160   : > { %2904 = vmatprep.mubr.bf16.mxu1 %v616_v5  ;;  %v878_v56 = vpop.f32.mrf.mxu0 }
 0x161   : > { %2905 = vmatmul.mubr.bf16.gmra.mxu1 %v617_v38  ;;  %2977 = vmatpush3.bf16.msra.mxu0 %v3263_v19 }
 0x162   : > { %2949 = vmatpush3.bf16.msra.mxu1 %v3249_v40  ;;  %2978 = vmatprep.subr.bf16.mxu0 %v3264_v52  ;;  %v2931_v57 = vpop.f32.mrf.mxu0 }
 0x163   : > { %2950 = vmatprep.subr.bf16.mxu1 %v3250_v41 }
 0x164   : > { %v881_v33 = vpop.f32.mrf.mxu0 }
 0x165   : > { %2979 = vmatpush3.bf16.msra.mxu0 %v3264_v52 }
 0x166   : > { %2951 = vmatpush3.bf16.msra.mxu1 %v3250_v41  ;;  %v2934_v2 = vpop.f32.mrf.mxu0  ;;  %2980 = vmatprep.subr.bf16.mxu0 %v3265_v24 }
 0x167   : > { %2952 = vmatprep.subr.bf16.mxu1 %v3251_v11 }
 0x168   : > { %v894_v17 = vpop.f32.mrf.mxu0 }
 0x169   : > { %2981 = vmatpush3.bf16.msra.mxu0 %v3265_v24 }
 0x16a   : > { %2953 = vmatpush3.bf16.msra.mxu1 %v3251_v11  ;;  %v2935_v48 = vpop.f32.mrf.mxu0  ;;  %2982 = vmatprep.subr.bf16.mxu0 %v3266_v37 }
 0x16b   : > { %2954 = vmatprep.subr.bf16.mxu1 %v3252_v43 }
 0x16d   : > { %2983 = vmatpush3.bf16.msra.mxu0 %v3266_v37 }
 0x16e   : > { %2955 = vmatpush3.bf16.msra.mxu1 %v3252_v43 }
 0x16f   : > { %3004 = vmatprep.subr.bf16.mxu1 %v3892_v44 }
 0x209   : > { %v2894_v34 = vpop.f32.mrf.mxu1 }
 0x20a   : > { %v871_v60 = vadd.f32 %v2926_v29, %v2894_v34  ;;  %v3905_v29 = vld [vmem:[#allocation5 + $0x9] ss:$0 sm:$0xff] }
 0x20b   : > { %v717_v49 = vpop.f32.mrf.mxu1 }
 0x20c   : > { %v932_v50 = vadd.f32 %v3895_v45, %v871_v60  ;;  %v863_v62 = vadd.f32 %v862_v53, %v717_v49 }
 0x20d   : > { %v2895_v7 = vpop.f32.mrf.mxu1 }
 0x20e   : > { %v964_v8 = vmul.f32 0.01, %v932_v50  ;;  %v930_v10 = vadd.f32 %v3895_v45, %v863_v62  ;;  %v874_v46 = vadd.f32 %v2927_v30, %v2895_v7  ;;  %vm948_vm0 = vcmp.gt.f32.partialorder %v932_v50, 0.0  ;;  %v897_v62 = vpop.f32.mrf.mxu0 }
 0x20f   : > { %v720_v13 = vpop.f32.mrf.mxu1 }
 0x210   : > { %v962_v14 = vmul.f32 0.01, %v930_v10  ;;  %v933_v1 = vadd.f32 %v3895_v45, %v874_v46  ;;  %vm946_vm1 = vcmp.gt.f32.partialorder %v930_v10, 0.0  ;;  %v866_v6 = vadd.f32 %v865_v54, %v720_v13 }
 0x211   : > { %v2898_v25 = vpop.f32.mrf.mxu1  ;;  %v980_v0 = vsel %vm948_vm0, %v932_v50, %v964_v8 }
 0x212   : > { %vm949_vm2 = vcmp.gt.f32.partialorder %v933_v1, 0.0  ;;  %v965_v16 = vmul.f32 0.01, %v933_v1  ;;  %v887_v5 = vadd.f32 %v2930_v55, %v2898_v25  ;;  %v931_v38 = vadd.f32 %v3895_v45, %v866_v6 }
 0x213   : > { %v733_v23 = vpop.f32.mrf.mxu1  ;;  %v978_v40 = vsel %vm946_vm1, %v930_v10, %v962_v14  ;;  %v1001_v51 = vmul.f32 %v3900_v61, %v980_v0 }
 0x214   : > { %v981_v41 = vsel %vm949_vm2, %v933_v1, %v965_v16  ;;  %v936_v11 = vadd.f32 %v3895_v45, %v887_v5  ;;  %v879_v43 = vadd.f32 %v878_v56, %v733_v23  ;;  %vm947_vm3 = vcmp.gt.f32.partialorder %v931_v38, 0.0 }
 0x215   : > { %v963_v19 = vmul.f32 0.01, %v931_v38  ;;  %v2899_v52 = vpop.f32.mrf.mxu1  ;;  %v1002_v53 = vmul.f32 %v3900_v61, %v981_v41  ;;  %v999_v49 = vmul.f32 %v3900_v61, %v978_v40  ;;  %v1022_v7 = vadd.f32 %v3905_v29, %v1001_v51  ;;  %v2938_v40 = vpop.f32.mrf.mxu0 }
 0x216   : > { %v934_v30 = vadd.f32 %v3895_v45, %v879_v43  ;;  %v890_v54 = vadd.f32 %v2931_v57, %v2899_v52  ;;  %v968_v34 = vmul.f32 0.01, %v936_v11  ;;  %vm952_vm4 = vcmp.gt.f32.partialorder %v936_v11, 0.0  ;;  %v3254_v52 = vld [vmem:[#allocation7 + $0x130] sm:$0xff]  }
 0x217   : > { %v979_v55 = vsel %vm947_vm3, %v931_v38, %v963_v19  ;;  %v736_v60 = vpop.f32.mrf.mxu1  ;;  %v1023_v13 = vadd.f32 %v3905_v29, %v1002_v53  ;;  %v1020_v0 = vadd.f32 %v3905_v29, %v999_v49 }
 0x218   : > { %v966_v56 = vmul.f32 0.01, %v934_v30  ;;  %v937_v50 = vadd.f32 %v3895_v45, %v890_v54  ;;  %vm950_vm5 = vcmp.gt.f32.partialorder %v934_v30, 0.0  ;;  %v882_v8 = vadd.f32 %v881_v33, %v736_v60 }
 0x219   : > { %v2902_v10 = vpop.f32.mrf.mxu1  ;;  %v1000_v46 = vmul.f32 %v3900_v61, %v979_v55  ;;  %v984_v1 = vsel %vm952_vm4, %v936_v11, %v968_v34  ;;  %v1037_v19 = vpack.c.bf16 %v1023_v13, %v1022_v7  ;;  %v3255_v13 = vld [vmem:[#allocation7 + $0x128] sm:$0xff]  }
 0x21a   : > { %vm953_vm6 = vcmp.gt.f32.partialorder %v937_v50, 0.0  ;;  %v969_v57 = vmul.f32 0.01, %v937_v50  ;;  %v903_v14 = vadd.f32 %v2934_v2, %v2902_v10  ;;  %v935_v6 = vadd.f32 %v3895_v45, %v882_v8 }
 0x21b   : > { %v749_v25 = vpop.f32.mrf.mxu1  ;;  %v1021_v16 = vadd.f32 %v3905_v29, %v1000_v46  ;;  %v982_v5 = vsel %vm950_vm5, %v934_v30, %v966_v56  ;;  %v1005_v30 = vmul.f32 %v3900_v61, %v984_v1  ;;  %v910_v56 = vpop.f32.mrf.mxu0 }
 0x21c   : > { %v985_v38 = vsel %vm953_vm6, %v937_v50, %v969_v57  ;;  %v940_v33 = vadd.f32 %v3895_v45, %v903_v14  ;;  %v895_v23 = vadd.f32 %v894_v17, %v749_v25  ;;  %vm951_vm7 = vcmp.gt.f32.partialorder %v935_v6, 0.0 }
 0x21d   : > { %v967_v41 = vmul.f32 0.01, %v935_v6  ;;  %v2903_v43 = vpop.f32.mrf.mxu1  ;;  %v1036_v51 = vpack.c.bf16 %v1021_v16, %v1020_v0  ;;  %v1003_v55 = vmul.f32 %v3900_v61, %v982_v5  ;;  %v1006_v34 = vmul.f32 %v3900_v61, %v985_v38  ;;  %v2939_v16 = vpop.f32.mrf.mxu0 }
 0x21e   : > { %v938_v2 = vadd.f32 %v3895_v45, %v895_v23  ;;  %v906_v11 = vadd.f32 %v2935_v48, %v2903_v43  ;;  %v972_v17 = vmul.f32 0.01, %v940_v33  ;;  %vm956_vm8 = vcmp.gt.f32.partialorder %v940_v33, 0.0 }
 0x21f   : > { %v983_v53 = vsel %vm951_vm7, %v935_v6, %v967_v41  ;;  %2956 = vmatprep.mubr.bf16.mxu1 %v1036_v51  ;;  %v752_v54 = vpop.f32.mrf.mxu1  ;;  %v1027_v46 = vadd.f32 %v3905_v29, %v1006_v34  ;;  %v1024_v1 = vadd.f32 %v3905_v29, %v1003_v55  ;;  %v913_v55 = vpop.f32.mrf.mxu0 }
 0x220   : > { %v970_v60 = vmul.f32 0.01, %v938_v2  ;;  %v941_v49 = vadd.f32 %v3895_v45, %v906_v11  ;;  %2957 = vmatmul.mubr.bf16.vlgmr.msra.gmra.mxu1 %v1037_v19  ;;  %vm954_vm9 = vcmp.gt.f32.partialorder %v938_v2, 0.0  ;;  %v898_v48 = vadd.f32 %v897_v62, %v752_v54  ;;  %v3256_v19 = vld [vmem:[#allocation7 + $0x120] sm:$0xff]  }
 0x221   : > { %3005 = vmatpush3.bf16.msra.mxu1 %v3892_v44  ;;  %v2906_v50 = vpop.f32.mrf.mxu1  ;;  %v1004_v7 = vmul.f32 %v3900_v61, %v983_v53  ;;  %v1026_v62 = vadd.f32 %v3905_v29, %v1005_v30  ;;  %v988_v44 = vsel %vm956_vm8, %v940_v33, %v972_v17 }
 0x222   : > { %vm957_vm10 = vcmp.gt.f32.partialorder %v941_v49, 0.0  ;;  %v973_v8 = vmul.f32 0.01, %v941_v49  ;;  %v919_v10 = vadd.f32 %v2938_v40, %v2906_v50  ;;  %3006 = vmatprep.subr.bf16.mxu1 %v3254_v52  ;;  %v939_v57 = vadd.f32 %v3895_v45, %v898_v48  ;;  %v3257_v50 = vld [vmem:[#allocation7 + $0x118] sm:$0xff]  }
 0x223   : > { %v765_v14 = vpop.f32.mrf.mxu1  ;;  %v1025_v6 = vadd.f32 %v3905_v29, %v1004_v7  ;;  %v986_v25 = vsel %vm954_vm9, %v938_v2, %v970_v60  ;;  %v1039_v11 = vpack.c.bf16 %v1027_v46, %v1026_v62  ;;  %v1009_v34 = vmul.f32 %v3900_v61, %v988_v44  ;;  %v3258_v44 = vld [vmem:[#allocation7 + $0x110] sm:$0xff]  }
 0x224   : > { %v989_v0 = vsel %vm957_vm10, %v941_v49, %v973_v8  ;;  %v911_v5 = vadd.f32 %v910_v56, %v765_v14  ;;  %vm955_vm11 = vcmp.gt.f32.partialorder %v939_v57, 0.0  ;;  %v971_v38 = vmul.f32 0.01, %v939_v57 }
 0x225   : > { %v944_v23 = vadd.f32 %v3895_v45, %v919_v10  ;;  %3007 = vmatpush3.bf16.msra.mxu1 %v3254_v52  ;;  %v2907_v40 = vpop.f32.mrf.mxu1  ;;  %v1038_v41 = vpack.c.bf16 %v1025_v6, %v1024_v1  ;;  %v1007_v2 = vmul.f32 %v3900_v61, %v986_v25  ;;  %v1010_v54 = vmul.f32 %v3900_v61, %v989_v0 }
 0x226   : > { %v942_v43 = vadd.f32 %v3895_v45, %v911_v5  ;;  %v922_v51 = vadd.f32 %v2939_v16, %v2907_v40  ;;  %3008 = vmatprep.subr.bf16.mxu1 %v3255_v13  ;;  %v987_v53 = vsel %vm955_vm11, %v939_v57, %v971_v38  ;;  %v1030_v14 = vadd.f32 %v3905_v29, %v1009_v34 }
 0x227   : > { %2960 = vmatprep.mubr.bf16.mxu1 %v1038_v41  ;;  %v768_v33 = vpop.f32.mrf.mxu1  ;;  %v976_v17 = vmul.f32 0.01, %v944_v23  ;;  %v1008_v49 = vmul.f32 %v3900_v61, %v987_v53  ;;  %vm960_vm13 = vcmp.gt.f32.partialorder %v944_v23, 0.0  ;;  %v1031_v48 = vadd.f32 %v3905_v29, %v1010_v54  ;;  %v3259_v41 = vld [vmem:[#allocation7 + $0x108] sm:$0xff]   ;;  %v3996_v53 = vld [vmem:[#allocation5 + $0x14] ss:$0 sm:$0xff] }
 0x228   : > { %vm958_vm12 = vcmp.gt.f32.partialorder %v942_v43, 0.0  ;;  %v974_v30 = vmul.f32 0.01, %v942_v43  ;;  %v945_v52 = vadd.f32 %v3895_v45, %v922_v51  ;;  %2961 = vmatmul.mubr.bf16.gmra.mxu1 %v1039_v11  ;;  %v914_v60 = vadd.f32 %v913_v55, %v768_v33 }
 0x229   : > { %3009 = vmatpush3.bf16.msra.mxu1 %v3255_v13  ;;  %v1028_v10 = vadd.f32 %v3905_v29, %v1007_v2  ;;  %v1029_v46 = vadd.f32 %v3905_v29, %v1008_v49  ;;  %v992_v13 = vsel %vm960_vm13, %v944_v23, %v976_v17  ;;  %v1041_v62 = vpack.c.bf16 %v1031_v48, %v1030_v14 }
 0x22a   : > { %vm961_vm14 = vcmp.gt.f32.partialorder %v945_v52, 0.0  ;;  %v977_v56 = vmul.f32 0.01, %v945_v52  ;;  %3010 = vmatprep.subr.bf16.mxu1 %v3256_v19  ;;  %v990_v7 = vsel %vm958_vm12, %v942_v43, %v974_v30  ;;  %v943_v8 = vadd.f32 %v3895_v45, %v914_v60 }
 0x22b   : > { %v1040_v6 = vpack.c.bf16 %v1029_v46, %v1028_v10  ;;  %v1011_v25 = vmul.f32 %v3900_v61, %v990_v7  ;;  %v1013_v5 = vmul.f32 %v3900_v61, %v992_v13 }
 0x22c   : > { %v993_v57 = vsel %vm961_vm14, %v945_v52, %v977_v56  ;;  %vm959_vm15 = vcmp.gt.f32.partialorder %v943_v8, 0.0  ;;  %v975_v1 = vmul.f32 0.01, %v943_v8 }
 0x22d   : > { %3011 = vmatpush3.bf16.msra.mxu1 %v3256_v19  ;;  %v1014_v0 = vmul.f32 %v3900_v61, %v993_v57  ;;  %2964 = vmatprep.mubr.bf16.mxu1 %v1040_v6  ;;  %v1032_v38 = vadd.f32 %v3905_v29, %v1011_v25  ;;  %v1034_v51 = vadd.f32 %v3905_v29, %v1013_v5  ;;  %v3260_v19 = vld [vmem:[#allocation7 + $0x100] sm:$0xff]  }
 0x22e   : > { %3012 = vmatprep.subr.bf16.mxu1 %v3257_v50  ;;  %v991_v45 = vsel %vm959_vm15, %v943_v8, %v975_v1 }
 0x22f   : > { %v1012_v16 = vmul.f32 %v3900_v61, %v991_v45  ;;  %v1035_v40 = vadd.f32 %v3905_v29, %v1014_v0 }
 0x230   : > { %2965 = vmatmul.mubr.bf16.gmra.mxu1 %v1041_v62 }
 0x231   : > { %3013 = vmatpush3.bf16.msra.mxu1 %v3257_v50  ;;  %v1033_v23 = vadd.f32 %v3905_v29, %v1012_v16  ;;  %v1043_v11 = vpack.c.bf16 %v1035_v40, %v1034_v51 }
 0x232   : > { %3014 = vmatprep.subr.bf16.mxu1 %v3258_v44 }
 0x233   : > { %v1042_v43 = vpack.c.bf16 %v1033_v23, %v1032_v38 }
 0x235   : > { %3015 = vmatpush3.bf16.msra.mxu1 %v3258_v44  ;;  %2968 = vmatprep.mubr.bf16.mxu1 %v1042_v43 }
 0x236   : > { %3016 = vmatprep.subr.bf16.mxu1 %v3259_v41 }
 0x238   : > { %2969 = vmatmul.mubr.bf16.gmra.mxu1 %v1043_v11 }
 0x239   : > { %3017 = vmatpush3.bf16.msra.mxu1 %v3259_v41  ;;  %3020 = vmatprep.mubr.bf16.mxu1 %v1343_v42  ;;  %v3979_v42 = vld [vmem:[#allocation5 + $0xa] ss:$0 sm:$0xff] }
 0x23a   : > { %3018 = vmatprep.subr.bf16.mxu1 %v3260_v19 }
 0x23d   : > { %3019 = vmatpush3.bf16.msra.mxu1 %v3260_v19 }
 0x240   : > { %3021 = vmatmul.mubr.bf16.vlgmr.msra.gmra.mxu1 %v1344_v47  ;;  %v3267_v47 = vld [vmem:[#allocation7 + $0x148] sm:$0xff]  }
 0x241   : > { %3024 = vmatprep.mubr.bf16.mxu1 %v1345_v18  ;;  %2984 = vmatprep.subr.bf16.mxu0 %v3267_v47 }
 0x242   : > { %2985 = vmatpush3.bf16.msra.mxu0 %v3267_v47 }
 0x243   : > { %2986 = vmatprep.subr.bf16.mxu0 %v3268_v21 }
 0x246   : > { %2987 = vmatpush3.bf16.msra.mxu0 %v3268_v21 }
 0x247   : > { %3036 = vmatprep.subr.bf16.mxu0 %v3976_v26 }
 0x248   : > { %3025 = vmatmul.mubr.bf16.gmra.mxu1 %v1346_v59 }
 0x249   : > { %3028 = vmatprep.mubr.bf16.mxu1 %v1347_v3 }
 0x250   : > { %3029 = vmatmul.mubr.bf16.gmra.mxu1 %v1348_v31 }
 0x251   : > { %3032 = vmatprep.mubr.bf16.mxu1 %v1349_v36 }
 0x258   : > { %3033 = vmatmul.mubr.bf16.gmra.mxu1 %v1350_v39 }
 0x2e0   : > { %v2958_v58 = vpop.f32.mrf.mxu1 }
 0x2e1   : > { %v1157_v12 = vadd.f32 %v2958_v58, %v3979_v42 }
 0x2e2   : > { %v1148_v18 = vpop.f32.mrf.mxu1 }
 0x2e3   : > { %vm1213_vm0 = vcmp.gt.f32.partialorder %v1157_v12, 0.0  ;;  %v1229_v20 = vmul.f32 0.01, %v1157_v12  ;;  %v1149_v9 = vadd.f32 %v3979_v42, %v1148_v18  ;;  %v3270_v18 = vld [vmem:[#allocation7 + $0x1b0] sm:$0xff]  }
 0x2e4   : > { %v2959_v59 = vpop.f32.mrf.mxu1 }
 0x2e5   : > { %v1245_v28 = vsel %vm1213_vm0, %v1157_v12, %v1229_v20  ;;  %vm1211_vm1 = vcmp.gt.f32.partialorder %v1149_v9, 0.0  ;;  %v1227_v3 = vmul.f32 0.01, %v1149_v9  ;;  %v1160_v32 = vadd.f32 %v2959_v59, %v3979_v42 }
 0x2e6   : > { %v1308_v15 = vmul.f32 %v3982_v22, %v1245_v28  ;;  %v1151_v31 = vpop.f32.mrf.mxu1  ;;  %v2024_v61 = vmul.f32 %v3987_v63, %v1245_v28 }
 0x2e7   : > { %v1243_v35 = vsel %vm1211_vm1, %v1149_v9, %v1227_v3  ;;  %vm1214_vm2 = vcmp.gt.f32.partialorder %v1160_v32, 0.0  ;;  %v1230_v4 = vmul.f32 0.01, %v1160_v32  ;;  %v1152_v36 = vadd.f32 %v3979_v42, %v1151_v31 }
 0x2e8   : > { %v3993_v39 = vadd.f32 %v3985_v27, %v1308_v15  ;;  %v2962_v29 = vpop.f32.mrf.mxu1  ;;  %v1306_v55 = vmul.f32 %v3982_v22, %v1243_v35  ;;  %v2022_v30 = vmul.f32 %v3987_v63, %v1243_v35  ;;  %v4005_v48 = vadd.f32 %v3996_v53, %v2024_v61 }
 0x2e9   : > { %v1246_v33 = vsel %vm1214_vm2, %v1160_v32, %v1230_v4  ;;  %vm1212_vm3 = vcmp.gt.f32.partialorder %v1152_v36, 0.0  ;;  %v1228_v2 = vmul.f32 0.01, %v1152_v36  ;;  %v1173_v54 = vadd.f32 %v2962_v29, %v3979_v42 }
 0x2ea   : > { %v1309_v52 = vmul.f32 %v3982_v22, %v1246_v33  ;;  %v2025_v34 = vmul.f32 %v3987_v63, %v1246_v33  ;;  %v1164_v17 = vpop.f32.mrf.mxu1  ;;  %v1327_v62 = vadd.f32 %v3985_v27, %v1306_v55  ;;  %v4018_v44 = vadd.f32 %v3996_v53, %v2022_v30 }
 0x2eb   : > { %v1244_v60 = vsel %vm1212_vm3, %v1152_v36, %v1228_v2  ;;  %vm1217_vm4 = vcmp.gt.f32.partialorder %v1173_v54, 0.0  ;;  %v1233_v49 = vmul.f32 0.01, %v1173_v54  ;;  %v1165_v56 = vadd.f32 %v3979_v42, %v1164_v17 }
 0x2ec   : > { %v1330_v50 = vadd.f32 %v3985_v27, %v1309_v52  ;;  %v4009_v7 = vadd.f32 %v3996_v53, %v2025_v34  ;;  %v1307_v8 = vmul.f32 %v3982_v22, %v1244_v60  ;;  %v2963_v10 = vpop.f32.mrf.mxu1  ;;  %v2023_v1 = vmul.f32 %v3987_v63, %v1244_v60 }
 0x2ed   : > { %v1249_v46 = vsel %vm1217_vm4, %v1173_v54, %v1233_v49  ;;  %vm1215_vm5 = vcmp.gt.f32.partialorder %v1165_v56, 0.0  ;;  %v1231_v57 = vmul.f32 0.01, %v1165_v56  ;;  %v1176_v14 = vadd.f32 %v2963_v10, %v3979_v42 }
 0x2ee   : > { %v2102_v13 = vpack.c.bf16 %v4009_v7, %v4005_v48  ;;  %v1167_v6 = vpop.f32.mrf.mxu1  ;;  %v1369_v16 = vpack.c.bf16 %v1330_v50, %v3993_v39  ;;  %v1312_v5 = vmul.f32 %v3982_v22, %v1249_v46  ;;  %v1328_v40 = vadd.f32 %v3985_v27, %v1307_v8  ;;  %v4238_v48 = vld [vmem:[#allocation5 + $0x12] ss:$0 sm:$0xff] }
 0x2ef   : > { %v1247_v25 = vsel %vm1215_vm5, %v1165_v56, %v1231_v57  ;;  %vm1218_vm6 = vcmp.gt.f32.partialorder %v1176_v14, 0.0  ;;  %v1234_v0 = vmul.f32 0.01, %v1176_v14  ;;  %v1168_v45 = vadd.f32 %v3979_v42, %v1167_v6 }
 0x2f0   : > { %v1310_v38 = vmul.f32 %v3982_v22, %v1247_v25  ;;  %v2966_v23 = vpop.f32.mrf.mxu1  ;;  %v4029_v11 = vmul.f32 %v3987_v63, %v1249_v46  ;;  %v4032_v19 = vmul.f32 %v3987_v63, %v1247_v25  ;;  %v1368_v47 = vpack.c.bf16 %v1328_v40, %v1327_v62 }
 0x2f1   : > { %v4025_v41 = vsel %vm1218_vm6, %v1176_v14, %v1234_v0  ;;  %vm1216_vm7 = vcmp.gt.f32.partialorder %v1168_v45, 0.0  ;;  %v1232_v43 = vmul.f32 0.01, %v1168_v45  ;;  %v1189_v51 = vadd.f32 %v2966_v23, %v3979_v42 }
 0x2f2   : > { %v1313_v24 = vmul.f32 %v3982_v22, %v4025_v41  ;;  %v1180_v37 = vpop.f32.mrf.mxu1  ;;  %2988 = vmatprep.mubr.bf16.mxu0 %v1368_v47  ;;  %v1331_v28 = vadd.f32 %v3985_v27, %v1310_v38  ;;  %v1333_v3 = vadd.f32 %v3985_v27, %v1312_v5  ;;  %v4049_v61 = vadd.f32 %v3996_v53, %v2023_v1 }
 0x2f3   : > { %v1248_v21 = vsel %vm1216_vm7, %v1168_v45, %v1232_v43  ;;  %vm1221_vm8 = vcmp.gt.f32.partialorder %v1189_v51, 0.0  ;;  %v1237_v58 = vmul.f32 0.01, %v1189_v51  ;;  %v1181_v12 = vadd.f32 %v3979_v42, %v1180_v37  ;;  %2989 = vmatmul.mubr.bf16.vlgmr.msra.gmra.mxu0 %v1369_v16 }
 0x2f4   : > { %v1311_v20 = vmul.f32 %v3982_v22, %v1248_v21  ;;  %v4039_v9 = vmul.f32 %v3987_v63, %v1248_v21  ;;  %v2967_v59 = vpop.f32.mrf.mxu1  ;;  %v1334_v39 = vadd.f32 %v3985_v27, %v1313_v24  ;;  %3037 = vmatpush3.bf16.msra.mxu0 %v3976_v26  ;;  %v3271_v26 = vld [vmem:[#allocation7 + $0x1a8] sm:$0xff]  }
 0x2f5   : > { %v1253_v32 = vsel %vm1221_vm8, %v1189_v51, %v1237_v58  ;;  %vm1219_vm9 = vcmp.gt.f32.partialorder %v1181_v12, 0.0  ;;  %v1235_v15 = vmul.f32 0.01, %v1181_v12  ;;  %v1192_v31 = vadd.f32 %v2967_v59, %v3979_v42  ;;  %3038 = vmatprep.subr.bf16.mxu0 %v3270_v18 }
 0x2f6   : > { %v2032_v35 = vmul.f32 %v3987_v63, %v1253_v32  ;;  %v1183_v4 = vpop.f32.mrf.mxu1  ;;  %v1332_v36 = vadd.f32 %v3985_v27, %v1311_v20  ;;  %v1316_v56 = vmul.f32 %v3982_v22, %v1253_v32  ;;  %v1371_v46 = vpack.c.bf16 %v1334_v39, %v1333_v3 }
 0x2f7   : > { %v1251_v29 = vsel %vm1219_vm9, %v1181_v12, %v1235_v15  ;;  %vm1222_vm10 = vcmp.gt.f32.partialorder %v1192_v31, 0.0  ;;  %v1238_v33 = vmul.f32 0.01, %v1192_v31  ;;  %v1184_v2 = vadd.f32 %v3979_v42, %v1183_v4 }
 0x2f8   : > { %v4053_v54 = vadd.f32 %v3996_v53, %v2032_v35  ;;  %v1314_v55 = vmul.f32 %v3982_v22, %v1251_v29  ;;  %v4057_v30 = vmul.f32 %v3987_v63, %v1251_v29  ;;  %v2970_v52 = vpop.f32.mrf.mxu1  ;;  %v1370_v34 = vpack.c.bf16 %v1332_v36, %v1331_v28  ;;  %3039 = vmatpush3.bf16.msra.mxu0 %v3270_v18 }
 0x2f9   : > { %v1254_v17 = vsel %vm1222_vm10, %v1192_v31, %v1238_v33  ;;  %vm1220_vm11 = vcmp.gt.f32.partialorder %v1184_v2, 0.0  ;;  %v1236_v60 = vmul.f32 0.01, %v1184_v2  ;;  %v1205_v49 = vadd.f32 %v2970_v52, %v3979_v42  ;;  %3040 = vmatprep.subr.bf16.mxu0 %v3271_v26 }
 0x2fa   : > { %v1317_v50 = vmul.f32 %v3982_v22, %v1254_v17  ;;  %v2033_v8 = vmul.f32 %v3987_v63, %v1254_v17  ;;  %v1196_v10 = vpop.f32.mrf.mxu1  ;;  %2992 = vmatprep.mubr.bf16.mxu0 %v1370_v34  ;;  %v1335_v45 = vadd.f32 %v3985_v27, %v1314_v55  ;;  %v2029_v58 = vmul.f32 %v3987_v63, %v4025_v41 }
 0x2fb   : > { %v1252_v57 = vsel %vm1220_vm11, %v1184_v2, %v1236_v60  ;;  %vm1225_vm12 = vcmp.gt.f32.partialorder %v1205_v49, 0.0  ;;  %v1241_v14 = vmul.f32 0.01, %v1205_v49  ;;  %v1197_v1 = vadd.f32 %v3979_v42, %v1196_v10  ;;  %2993 = vmatmul.mubr.bf16.gmra.mxu0 %v1371_v46  ;;  %v3272_v46 = vld [vmem:[#allocation7 + $0x1a0] sm:$0xff]  }
 0x2fc   : > { %v4065_v6 = vadd.f32 %v3996_v53, %v2033_v8  ;;  %v1315_v62 = vmul.f32 %v3982_v22, %v1252_v57  ;;  %v2031_v25 = vmul.f32 %v3987_v63, %v1252_v57  ;;  %v2971_v0 = vpop.f32.mrf.mxu1  ;;  %v1338_v24 = vadd.f32 %v3985_v27, %v1317_v50  ;;  %3041 = vmatpush3.bf16.msra.mxu0 %v3271_v26  ;;  %v3273_v57 = vld [vmem:[#allocation7 + $0x198] sm:$0xff]  }
 0x2fd   : > { %v1257_v16 = vsel %vm1225_vm12, %v1205_v49, %v1241_v14  ;;  %vm1223_vm13 = vcmp.gt.f32.partialorder %v1197_v1, 0.0  ;;  %v1239_v5 = vmul.f32 0.01, %v1197_v1  ;;  %v1208_v38 = vadd.f32 %v2971_v0, %v3979_v42  ;;  %3042 = vmatprep.subr.bf16.mxu0 %v3272_v46  ;;  %v3274_v14 = vld [vmem:[#allocation7 + $0x190] sm:$0xff]   ;;  %v3287_v0 = vld [vmem:[#allocation7 + $0x228] sm:$0xff]  }
 0x2fe   : > { %v2106_v23 = vpack.c.bf16 %v4065_v6, %v4053_v54  ;;  %v2036_v40 = vmul.f32 %v3987_v63, %v1257_v16  ;;  %v1199_v43 = vpop.f32.mrf.mxu1  ;;  %v1336_v51 = vadd.f32 %v3985_v27, %v1315_v62  ;;  %v1337_v20 = vadd.f32 %v3985_v27, %v1316_v56  ;;  %v3285_v62 = vld [vmem:[#allocation7 + $0x238] sm:$0xff]  }
 0x2ff   : > { %v1255_v37 = vsel %vm1223_vm13, %v1197_v1, %v1239_v5  ;;  %vm1226_vm14 = vcmp.gt.f32.partialorder %v1208_v38, 0.0  ;;  %v1242_v47 = vmul.f32 0.01, %v1208_v38  ;;  %v1200_v21 = vadd.f32 %v3979_v42, %v1199_v43  ;;  %v3276_v1 = vld [vmem:[#allocation7 + $0x180] sm:$0xff]   ;;  %3068 = vmatprep.subr.bf16.mxu1 %v3285_v62 }
 0x300   : > { %v2034_v12 = vmul.f32 %v3987_v63, %v1255_v37  ;;  %v1372_v18 = vpack.c.bf16 %v1336_v51, %v1335_v45  ;;  %v1320_v59 = vmul.f32 %v3982_v22, %v1257_v16  ;;  %v1318_v32 = vmul.f32 %v3982_v22, %v1255_v37  ;;  %3043 = vmatpush3.bf16.msra.mxu0 %v3272_v46  ;;  %v3288_v45 = vld [vmem:[#allocation7 + $0x220] sm:$0xff]   ;;  %v3022_v16 = vpop.f32.mrf.mxu1 }
 0x301   : > { %v1258_v28 = vsel %vm1226_vm14, %v1208_v38, %v1242_v47  ;;  %vm1224_vm15 = vcmp.gt.f32.partialorder %v1200_v21, 0.0  ;;  %v1240_v3 = vmul.f32 0.01, %v1200_v21  ;;  %v1373_v42 = vpack.c.bf16 %v1338_v24, %v1337_v20  ;;  %3044 = vmatprep.subr.bf16.mxu0 %v3273_v57  ;;  %3069 = vmatpush3.bf16.msra.mxu1 %v3285_v62 }
 0x302   : > { %v2037_v15 = vmul.f32 %v3987_v63, %v1258_v28  ;;  %2996 = vmatprep.mubr.bf16.mxu0 %v1372_v18  ;;  %v2101_v31 = vpack.c.bf16 %v4049_v61, %v4018_v44  ;;  %v1321_v41 = vmul.f32 %v3982_v22, %v1258_v28  ;;  %v4089_v4 = vadd.f32 %v3996_v53, %v4032_v19  ;;  %v1620_v5 = vpop.f32.mrf.mxu1  ;;  %v3290_v44 = vld [vmem:[#allocation7 + $0x210] sm:$0xff]   ;;  %v3291_v61 = vld [vmem:[#allocation7 + $0x208] sm:$0xff]  }
 0x303   : > { %v1256_v35 = vsel %vm1224_vm15, %v1200_v21, %v1240_v3  ;;  %v4093_v36 = vadd.f32 %v3996_v53, %v4039_v9  ;;  %v4099_v33 = vadd.f32 %v3996_v53, %v4029_v11  ;;  %v4102_v2 = vadd.f32 %v3996_v53, %v2029_v58  ;;  %2997 = vmatmul.mubr.bf16.gmra.mxu0 %v1373_v42  ;;  %v4140_v21 = vld [vmem:[#allocation5 + $0xf] ss:$0 sm:$0xff] }
 0x304   : > { %v1319_v39 = vmul.f32 %v3982_v22, %v1256_v35  ;;  %v2035_v29 = vmul.f32 %v3987_v63, %v1256_v35  ;;  %v4108_v55 = vadd.f32 %v3996_v53, %v4057_v30  ;;  %v4111_v9 = vadd.f32 %v3996_v53, %v2031_v25  ;;  %3045 = vmatpush3.bf16.msra.mxu0 %v3273_v57  ;;  %v3286_v25 = vld [vmem:[#allocation7 + $0x230] sm:$0xff]   ;;  %v3023_v38 = vpop.f32.mrf.mxu1 }
 0x305   : > { %v2103_v19 = vpack.c.bf16 %v4093_v36, %v4089_v4  ;;  %v4114_v22 = vadd.f32 %v3996_v53, %v2034_v12  ;;  %v1339_v63 = vadd.f32 %v3985_v27, %v1318_v32  ;;  %v2104_v52 = vpack.c.bf16 %v4102_v2, %v4099_v33  ;;  %3046 = vmatprep.subr.bf16.mxu0 %v3274_v14 }
 0x306   : > { %v1340_v11 = vadd.f32 %v3985_v27, %v1319_v39  ;;  %v4121_v34 = vadd.f32 %v3996_v53, %v2035_v29  ;;  %v1342_v26 = vadd.f32 %v3985_v27, %v1321_v41  ;;  %v2105_v30 = vpack.c.bf16 %v4111_v9, %v4108_v55  ;;  %3070 = vmatprep.subr.bf16.mxu1 %v3286_v25 }
 0x307   : > { %v4127_v17 = vadd.f32 %v3996_v53, %v2036_v40  ;;  %v4130_v60 = vadd.f32 %v3996_v53, %v2037_v15  ;;  %v1341_v50 = vadd.f32 %v3985_v27, %v1320_v59  ;;  %v3275_v53 = vld [vmem:[#allocation7 + $0x188] sm:$0xff]   ;;  %v4137_v27 = vld [vmem:[#allocation7 + $0x1f8] sm:$0xff]   ;;  %3071 = vmatpush3.bf16.msra.mxu1 %v3286_v25  ;;  %v1623_v40 = vpop.f32.mrf.mxu1 }
 0x308   : > { %v1374_v49 = vpack.c.bf16 %v1340_v11, %v1339_v63  ;;  %v2107_v56 = vpack.c.bf16 %v4121_v34, %v4114_v22  ;;  %3047 = vmatpush3.bf16.msra.mxu0 %v3274_v14  ;;  %3072 = vmatprep.subr.bf16.mxu1 %v3287_v0 }
 0x309   : > { %v2108_v8 = vpack.c.bf16 %v4130_v60, %v4127_v17  ;;  %v1375_v10 = vpack.c.bf16 %v1342_v26, %v1341_v50  ;;  %3048 = vmatprep.subr.bf16.mxu0 %v3275_v53  ;;  %v3026_v43 = vpop.f32.mrf.mxu1  ;;  %v4145_v26 = vld [vmem:[#allocation5 + $0x10] ss:$0 sm:$0xff] }
 0x30a   : > { %3000 = vmatprep.mubr.bf16.mxu0 %v1374_v49 }
 0x30b   : > { %3001 = vmatmul.mubr.bf16.gmra.mxu0 %v1375_v10  ;;  %3073 = vmatpush3.bf16.msra.mxu1 %v3287_v0  ;;  %v1636_v51 = vpop.f32.mrf.mxu1 }
 0x30c   : > { %3049 = vmatpush3.bf16.msra.mxu0 %v3275_v53  ;;  %3074 = vmatprep.subr.bf16.mxu1 %v3288_v45 }
 0x30d   : > { %3050 = vmatprep.subr.bf16.mxu0 %v3276_v1  ;;  %v3027_v24 = vpop.f32.mrf.mxu1 }
 0x30f   : > { %3075 = vmatpush3.bf16.msra.mxu1 %v3288_v45  ;;  %v1639_v37 = vpop.f32.mrf.mxu1 }
 0x310   : > { %3051 = vmatpush3.bf16.msra.mxu0 %v3276_v1 }
 0x311   : > { %3100 = vmatprep.subr.bf16.mxu0 %v4137_v27  ;;  %v3030_v18 = vpop.f32.mrf.mxu1 }
 0x313   : > { %v1652_v41 = vpop.f32.mrf.mxu1 }
 0x315   : > { %v3031_v57 = vpop.f32.mrf.mxu1 }
 0x3b3   : > { %v2990_v47 = vpop.f32.mrf.mxu0 }
 0x3b4   : > { %v1629_v58 = vadd.f32 %v3022_v16, %v2990_v47  ;;  %v4150_v16 = vld [vmem:[#allocation5 + $0x11] ss:$0 sm:$0xff] }
 0x3b5   : > { %v1475_v12 = vpop.f32.mrf.mxu0 }
 0x3b6   : > { %v1690_v20 = vadd.f32 %v4140_v21, %v1629_v58  ;;  %v1621_v59 = vadd.f32 %v1620_v5, %v1475_v12 }
 0x3b7   : > { %v2991_v28 = vpop.f32.mrf.mxu0 }
 0x3b8   : > { %v1722_v3 = vmul.f32 0.01, %v1690_v20  ;;  %v1688_v32 = vadd.f32 %v4140_v21, %v1621_v59  ;;  %v1632_v15 = vadd.f32 %v3023_v38, %v2991_v28  ;;  %vm1706_vm0 = vcmp.gt.f32.partialorder %v1690_v20, 0.0 }
 0x3b9   : > { %v1478_v42 = vpop.f32.mrf.mxu0 }
 0x3ba   : > { %v1720_v35 = vmul.f32 0.01, %v1688_v32  ;;  %v1691_v39 = vadd.f32 %v4140_v21, %v1632_v15  ;;  %vm1704_vm1 = vcmp.gt.f32.partialorder %v1688_v32, 0.0  ;;  %v1624_v29 = vadd.f32 %v1623_v40, %v1478_v42 }
 0x3bb   : > { %v2994_v63 = vpop.f32.mrf.mxu0  ;;  %v1738_v11 = vsel %vm1706_vm0, %v1690_v20, %v1722_v3  ;;  %v1655_v20 = vpop.f32.mrf.mxu1 }
 0x3bc   : > { %vm1707_vm2 = vcmp.gt.f32.partialorder %v1691_v39, 0.0  ;;  %v1723_v49 = vmul.f32 0.01, %v1691_v39  ;;  %v1645_v50 = vadd.f32 %v3026_v43, %v2994_v63  ;;  %v1689_v10 = vadd.f32 %v4140_v21, %v1624_v29 }
 0x3bd   : > { %v1491_v46 = vpop.f32.mrf.mxu0  ;;  %v1736_v14 = vsel %vm1704_vm1, %v1688_v32, %v1720_v35  ;;  %v1759_v25 = vmul.f32 %v4145_v26, %v1738_v11 }
 0x3be   : > { %v1739_v53 = vsel %vm1707_vm2, %v1691_v39, %v1723_v49  ;;  %v1694_v1 = vadd.f32 %v4140_v21, %v1645_v50  ;;  %v1637_v62 = vadd.f32 %v1636_v51, %v1491_v46  ;;  %vm1705_vm3 = vcmp.gt.f32.partialorder %v1689_v10, 0.0  ;;  %v3034_v50 = vpop.f32.mrf.mxu1 }
 0x3bf   : > { %v1721_v0 = vmul.f32 0.01, %v1689_v10  ;;  %v2995_v45 = vpop.f32.mrf.mxu0  ;;  %v1760_v5 = vmul.f32 %v4145_v26, %v1739_v53  ;;  %v1757_v12 = vmul.f32 %v4145_v26, %v1736_v14  ;;  %v1780_v28 = vadd.f32 %v4150_v16, %v1759_v25 }
 0x3c0   : > { %v1692_v38 = vadd.f32 %v4140_v21, %v1637_v62  ;;  %v1648_v40 = vadd.f32 %v3027_v24, %v2995_v45  ;;  %v1726_v47 = vmul.f32 0.01, %v1694_v1  ;;  %vm1710_vm4 = vcmp.gt.f32.partialorder %v1694_v1, 0.0  ;;  %v4164_v45 = vld [vmem:[#allocation7 + $0x1f0] sm:$0xff]  }
 0x3c1   : > { %v1737_v43 = vsel %vm1705_vm3, %v1689_v10, %v1721_v0  ;;  %v1494_v58 = vpop.f32.mrf.mxu0  ;;  %v1781_v42 = vadd.f32 %v4150_v16, %v1760_v5  ;;  %v1778_v11 = vadd.f32 %v4150_v16, %v1757_v12 }
 0x3c2   : > { %v1724_v51 = vmul.f32 0.01, %v1692_v38  ;;  %v1695_v59 = vadd.f32 %v4140_v21, %v1648_v40  ;;  %vm1708_vm5 = vcmp.gt.f32.partialorder %v1692_v38, 0.0  ;;  %v1640_v3 = vadd.f32 %v1639_v37, %v1494_v58 }
 0x3c3   : > { %v2998_v32 = vpop.f32.mrf.mxu0  ;;  %v1758_v15 = vmul.f32 %v4145_v26, %v1737_v43  ;;  %v1742_v39 = vsel %vm1710_vm4, %v1694_v1, %v1726_v47  ;;  %v1795_v0 = vpack.c.bf16 %v1781_v42, %v1780_v28  ;;  %v4174_v42 = vld [vmem:[#allocation7 + $0x1e8] sm:$0xff]  }
 0x3c4   : > { %vm1711_vm6 = vcmp.gt.f32.partialorder %v1695_v59, 0.0  ;;  %v1727_v24 = vmul.f32 0.01, %v1695_v59  ;;  %v1661_v35 = vadd.f32 %v3030_v18, %v2998_v32  ;;  %v1693_v29 = vadd.f32 %v4140_v21, %v1640_v3 }
 0x3c5   : > { %v1507_v63 = vpop.f32.mrf.mxu0  ;;  %v1779_v49 = vadd.f32 %v4150_v16, %v1758_v15  ;;  %v1740_v10 = vsel %vm1708_vm5, %v1692_v38, %v1724_v51  ;;  %v1763_v38 = vmul.f32 %v4145_v26, %v1742_v39 }
 0x3c6   : > { %v1743_v46 = vsel %vm1711_vm6, %v1695_v59, %v1727_v24  ;;  %v1698_v37 = vadd.f32 %v4140_v21, %v1661_v35  ;;  %v1653_v14 = vadd.f32 %v1652_v41, %v1507_v63  ;;  %vm1709_vm7 = vcmp.gt.f32.partialorder %v1693_v29, 0.0  ;;  %v1668_v41 = vpop.f32.mrf.mxu1 }
 0x3c7   : > { %v1725_v53 = vmul.f32 0.01, %v1693_v29  ;;  %v2999_v62 = vpop.f32.mrf.mxu0  ;;  %v1794_v25 = vpack.c.bf16 %v1779_v49, %v1778_v11  ;;  %v1761_v43 = vmul.f32 %v4145_v26, %v1740_v10  ;;  %v1764_v47 = vmul.f32 %v4145_v26, %v1743_v46 }
 0x3c8   : > { %v1696_v18 = vadd.f32 %v4140_v21, %v1653_v14  ;;  %v1664_v1 = vadd.f32 %v3031_v57, %v2999_v62  ;;  %v1730_v58 = vmul.f32 0.01, %v1698_v37  ;;  %vm1714_vm8 = vcmp.gt.f32.partialorder %v1698_v37, 0.0  ;;  %v3035_v63 = vpop.f32.mrf.mxu1 }
 0x3c9   : > { %v1741_v5 = vsel %vm1709_vm7, %v1693_v29, %v1725_v53  ;;  %3052 = vmatprep.mubr.bf16.mxu0 %v1794_v25  ;;  %v1510_v40 = vpop.f32.mrf.mxu0  ;;  %v1785_v15 = vadd.f32 %v4150_v16, %v1764_v47  ;;  %v1782_v39 = vadd.f32 %v4150_v16, %v1761_v43  ;;  %v1784_v29 = vadd.f32 %v4150_v16, %v1763_v38 }
 0x3ca   : > { %v1728_v12 = vmul.f32 0.01, %v1696_v18  ;;  %v1699_v51 = vadd.f32 %v4140_v21, %v1664_v1  ;;  %3053 = vmatmul.mubr.bf16.vlgmr.msra.gmra.mxu0 %v1795_v0  ;;  %vm1712_vm9 = vcmp.gt.f32.partialorder %v1696_v18, 0.0  ;;  %v1656_v57 = vadd.f32 %v1655_v20, %v1510_v40  ;;  %v1671_v38 = vpop.f32.mrf.mxu1 }
 0x3cb   : > { %3101 = vmatpush3.bf16.msra.mxu0 %v4137_v27  ;;  %v3002_v59 = vpop.f32.mrf.mxu0  ;;  %v1762_v28 = vmul.f32 %v4145_v26, %v1741_v5  ;;  %v1746_v11 = vsel %vm1714_vm8, %v1698_v37, %v1730_v58  ;;  %v1797_v0 = vpack.c.bf16 %v1785_v15, %v1784_v29  ;;  %v4186_v5 = vld [vmem:[#allocation7 + $0x1e0] sm:$0xff]  }
 0x3cc   : > { %vm1715_vm10 = vcmp.gt.f32.partialorder %v1699_v51, 0.0  ;;  %v1731_v3 = vmul.f32 0.01, %v1699_v51  ;;  %v1677_v32 = vadd.f32 %v3034_v50, %v3002_v59  ;;  %3102 = vmatprep.subr.bf16.mxu0 %v4164_v45  ;;  %v1697_v24 = vadd.f32 %v4140_v21, %v1656_v57 }
 0x3cd   : > { %v1523_v35 = vpop.f32.mrf.mxu0  ;;  %v1783_v20 = vadd.f32 %v4150_v16, %v1762_v28  ;;  %v1744_v49 = vsel %vm1712_vm9, %v1696_v18, %v1728_v12  ;;  %v1767_v58 = vmul.f32 %v4145_v26, %v1746_v11 }
 0x3ce   : > { %v1747_v50 = vsel %vm1715_vm10, %v1699_v51, %v1731_v3  ;;  %v1669_v10 = vadd.f32 %v1668_v41, %v1523_v35  ;;  %vm1713_vm11 = vcmp.gt.f32.partialorder %v1697_v24, 0.0  ;;  %v1729_v46 = vmul.f32 0.01, %v1697_v24  ;;  %v4196_v3 = vld [vmem:[#allocation7 + $0x1d8] sm:$0xff]  }
 0x3cf   : > { %v1702_v14 = vadd.f32 %v4140_v21, %v1677_v32  ;;  %3103 = vmatpush3.bf16.msra.mxu0 %v4164_v45  ;;  %v3003_v53 = vpop.f32.mrf.mxu0  ;;  %v1796_v62 = vpack.c.bf16 %v1783_v20, %v1782_v39  ;;  %v1765_v40 = vmul.f32 %v4145_v26, %v1744_v49  ;;  %v1768_v43 = vmul.f32 %v4145_v26, %v1747_v50  ;;  %v4204_v50 = vld [vmem:[#allocation7 + $0x1d0] sm:$0xff]  }
 0x3d0   : > { %v1700_v25 = vadd.f32 %v4140_v21, %v1669_v10  ;;  %v1680_v1 = vadd.f32 %v3035_v63, %v3003_v53  ;;  %3104 = vmatprep.subr.bf16.mxu0 %v4174_v42  ;;  %v1745_v37 = vsel %vm1713_vm11, %v1697_v24, %v1729_v46  ;;  %v1788_v20 = vadd.f32 %v4150_v16, %v1767_v58 }
 0x3d1   : > { %3056 = vmatprep.mubr.bf16.mxu0 %v1796_v62  ;;  %v1526_v18 = vpop.f32.mrf.mxu0  ;;  %v1734_v12 = vmul.f32 0.01, %v1702_v14  ;;  %v1766_v57 = vmul.f32 %v4145_v26, %v1745_v37  ;;  %vm1718_vm13 = vcmp.gt.f32.partialorder %v1702_v14, 0.0  ;;  %v1789_v28 = vadd.f32 %v4150_v16, %v1768_v43 }
 0x3d2   : > { %vm1716_vm12 = vcmp.gt.f32.partialorder %v1700_v25, 0.0  ;;  %v1732_v47 = vmul.f32 0.01, %v1700_v25  ;;  %v1703_v41 = vadd.f32 %v4140_v21, %v1680_v1  ;;  %3057 = vmatmul.mubr.bf16.gmra.mxu0 %v1797_v0  ;;  %v1672_v51 = vadd.f32 %v1671_v38, %v1526_v18  ;;  %v4215_v0 = vld [vmem:[#allocation7 + $0x1c8] sm:$0xff]  }
 0x3d3   : > { %3105 = vmatpush3.bf16.msra.mxu0 %v4174_v42  ;;  %v1786_v24 = vadd.f32 %v4150_v16, %v1765_v40  ;;  %v1787_v35 = vadd.f32 %v4150_v16, %v1766_v57  ;;  %v1750_v29 = vsel %vm1718_vm13, %v1702_v14, %v1734_v12  ;;  %v1799_v49 = vpack.c.bf16 %v1789_v28, %v1788_v20 }
 0x3d4   : > { %vm1719_vm14 = vcmp.gt.f32.partialorder %v1703_v41, 0.0  ;;  %v1735_v59 = vmul.f32 0.01, %v1703_v41  ;;  %3106 = vmatprep.subr.bf16.mxu0 %v4186_v5  ;;  %v1748_v32 = vsel %vm1716_vm12, %v1700_v25, %v1732_v47  ;;  %v1701_v15 = vadd.f32 %v4140_v21, %v1672_v51  ;;  %v4243_v47 = vld [vmem:[#allocation5 + $0x15] ss:$0 sm:$0xff] }
 0x3d5   : > { %v1798_v11 = vpack.c.bf16 %v1787_v35, %v1786_v24  ;;  %v1769_v21 = vmul.f32 %v4145_v26, %v1748_v32  ;;  %v1771_v14 = vmul.f32 %v4145_v26, %v1750_v29 }
 0x3d6   : > { %v1751_v39 = vsel %vm1719_vm14, %v1703_v41, %v1735_v59  ;;  %vm1717_vm15 = vcmp.gt.f32.partialorder %v1701_v15, 0.0  ;;  %v1733_v63 = vmul.f32 0.01, %v1701_v15 }
 0x3d7   : > { %3107 = vmatpush3.bf16.msra.mxu0 %v4186_v5  ;;  %v1772_v10 = vmul.f32 %v4145_v26, %v1751_v39  ;;  %3060 = vmatprep.mubr.bf16.mxu0 %v1798_v11  ;;  %v1790_v62 = vadd.f32 %v4150_v16, %v1769_v21  ;;  %v1792_v18 = vadd.f32 %v4150_v16, %v1771_v14  ;;  %v4250_v39 = vld [vmem:[#allocation5 + $0x16] ss:$0 sm:$0xff] }
 0x3d8   : > { %3108 = vmatprep.subr.bf16.mxu0 %v4196_v3  ;;  %v1749_v46 = vsel %vm1717_vm15, %v1701_v15, %v1733_v63 }
 0x3d9   : > { %v1770_v53 = vmul.f32 %v4145_v26, %v1749_v46  ;;  %v1793_v1 = vadd.f32 %v4150_v16, %v1772_v10  ;;  %v4220_v26 = vld [vmem:[#allocation7 + $0x1c0] sm:$0xff]  }
 0x3da   : > { %3061 = vmatmul.mubr.bf16.gmra.mxu0 %v1799_v49 }
 0x3db   : > { %3109 = vmatpush3.bf16.msra.mxu0 %v4196_v3  ;;  %v1791_v25 = vadd.f32 %v4150_v16, %v1770_v53  ;;  %v1801_v40 = vpack.c.bf16 %v1793_v1, %v1792_v18  ;;  %v3289_v16 = vld [vmem:[#allocation7 + $0x218] sm:$0xff]  }
 0x3dc   : > { %3110 = vmatprep.subr.bf16.mxu0 %v4204_v50  ;;  %3076 = vmatprep.subr.bf16.mxu1 %v3289_v16 }
 0x3dd   : > { %v1800_v37 = vpack.c.bf16 %v1791_v25, %v1790_v62  ;;  %3077 = vmatpush3.bf16.msra.mxu1 %v3289_v16 }
 0x3de   : > { %3078 = vmatprep.subr.bf16.mxu1 %v3290_v44 }
 0x3df   : > { %3111 = vmatpush3.bf16.msra.mxu0 %v4204_v50  ;;  %3064 = vmatprep.mubr.bf16.mxu0 %v1800_v37 }
 0x3e0   : > { %3112 = vmatprep.subr.bf16.mxu0 %v4215_v0 }
 0x3e1   : > { %3079 = vmatpush3.bf16.msra.mxu1 %v3290_v44 }
 0x3e2   : > { %3065 = vmatmul.mubr.bf16.gmra.mxu0 %v1801_v40  ;;  %3080 = vmatprep.subr.bf16.mxu1 %v3291_v61 }
 0x3e3   : > { %3113 = vmatpush3.bf16.msra.mxu0 %v4215_v0  ;;  %3116 = vmatprep.mubr.bf16.mxu0 %v2101_v31  ;;  %v3292_v31 = vld [vmem:[#allocation7 + $0x200] sm:$0xff]  }
 0x3e4   : > { %3114 = vmatprep.subr.bf16.mxu0 %v4220_v26 }
 0x3e5   : > { %3081 = vmatpush3.bf16.msra.mxu1 %v3291_v61 }
 0x3e6   : > { %3082 = vmatprep.subr.bf16.mxu1 %v3292_v31 }
 0x3e7   : > { %3115 = vmatpush3.bf16.msra.mxu0 %v4220_v26 }
 0x3e9   : > { %3083 = vmatpush3.bf16.msra.mxu1 %v3292_v31 }
 0x3ea   : > { %3117 = vmatmul.mubr.bf16.vlgmr.msra.gmra.mxu0 %v2102_v13  ;;  %3132 = vmatprep.subr.bf16.mxu1 %v4137_v27 }
 0x3eb   : > { %3120 = vmatprep.mubr.bf16.mxu0 %v2103_v19 }
 0x3f2   : > { %3121 = vmatmul.mubr.bf16.gmra.mxu0 %v2104_v52 }
 0x48a   : > { %v3054_v7 = vpop.f32.mrf.mxu0 }
 0x48b   : > { %v1915_v13 = vadd.f32 %v3054_v7, %v4238_v48 }
 0x48c   : > { %v1906_v4 = vpop.f32.mrf.mxu0 }
 0x48d   : > { %vm1971_vm0 = vcmp.gt.f32.partialorder %v1915_v13, 0.0  ;;  %v1987_v36 = vmul.f32 0.01, %v1915_v13  ;;  %v1907_v33 = vadd.f32 %v4238_v48, %v1906_v4 }
 0x48e   : > { %v3055_v2 = vpop.f32.mrf.mxu0 }
 0x48f   : > { %vm1969_vm1 = vcmp.gt.f32.partialorder %v1907_v33, 0.0  ;;  %v1985_v19 = vmul.f32 0.01, %v1907_v33  ;;  %v1918_v52 = vadd.f32 %v3055_v2, %v4238_v48  ;;  %v2003_v43 = vsel %vm1971_vm0, %v1915_v13, %v1987_v36 }
 0x490   : > { %v1909_v38 = vpop.f32.mrf.mxu0  ;;  %v2066_v32 = vmul.f32 %v4243_v47, %v2003_v43 }
 0x491   : > { %v2001_v41 = vsel %vm1969_vm1, %v1907_v33, %v1985_v19  ;;  %vm1972_vm2 = vcmp.gt.f32.partialorder %v1918_v52, 0.0  ;;  %v1988_v58 = vmul.f32 0.01, %v1918_v52  ;;  %v1910_v12 = vadd.f32 %v4238_v48, %v1909_v38 }
 0x492   : > { %v3058_v51 = vpop.f32.mrf.mxu0  ;;  %v2064_v15 = vmul.f32 %v4243_v47, %v2001_v41  ;;  %v2087_v53 = vadd.f32 %v4250_v39, %v2066_v32 }
 0x493   : > { %v2004_v57 = vsel %vm1972_vm2, %v1918_v52, %v1988_v58  ;;  %vm1970_vm3 = vcmp.gt.f32.partialorder %v1910_v12, 0.0  ;;  %v1986_v59 = vmul.f32 0.01, %v1910_v12  ;;  %v1931_v28 = vadd.f32 %v3058_v51, %v4238_v48 }
 0x494   : > { %v2067_v24 = vmul.f32 %v4243_v47, %v2004_v57  ;;  %v1922_v35 = vpop.f32.mrf.mxu0  ;;  %v2085_v25 = vadd.f32 %v4250_v39, %v2064_v15 }
 0x495   : > { %v2002_v20 = vsel %vm1970_vm3, %v1910_v12, %v1986_v59  ;;  %vm1975_vm4 = vcmp.gt.f32.partialorder %v1931_v28, 0.0  ;;  %v1991_v29 = vmul.f32 0.01, %v1931_v28  ;;  %v1923_v63 = vadd.f32 %v4238_v48, %v1922_v35 }
 0x496   : > { %v2088_v11 = vadd.f32 %v4250_v39, %v2067_v24  ;;  %v2065_v49 = vmul.f32 %v4243_v47, %v2002_v20  ;;  %v3059_v21 = vpop.f32.mrf.mxu0 }
 0x497   : > { %vm1973_vm5 = vcmp.gt.f32.partialorder %v1923_v63, 0.0  ;;  %v1989_v10 = vmul.f32 0.01, %v1923_v63  ;;  %v1934_v46 = vadd.f32 %v3059_v21, %v4238_v48  ;;  %v2007_v14 = vsel %vm1975_vm4, %v1931_v28, %v1991_v29 }
 0x498   : > { %v1925_v62 = vpop.f32.mrf.mxu0  ;;  %v2086_v1 = vadd.f32 %v4250_v39, %v2065_v49  ;;  %v2127_v16 = vpack.c.bf16 %v2088_v11, %v2087_v53  ;;  %v2070_v4 = vmul.f32 %v4243_v47, %v2007_v14 }
 0x499   : > { %v2005_v37 = vsel %vm1973_vm5, %v1923_v63, %v1989_v10  ;;  %vm1976_vm6 = vcmp.gt.f32.partialorder %v1934_v46, 0.0  ;;  %v1992_v18 = vmul.f32 0.01, %v1934_v46  ;;  %v1926_v40 = vadd.f32 %v4238_v48, %v1925_v62 }
 0x49a   : > { %v3062_v44 = vpop.f32.mrf.mxu0  ;;  %v2126_v61 = vpack.c.bf16 %v2086_v1, %v2085_v25  ;;  %v2068_v36 = vmul.f32 %v4243_v47, %v2005_v37  ;;  %v2091_v15 = vadd.f32 %v4250_v39, %v2070_v4 }
 0x49b   : > { %v2008_v31 = vsel %vm1976_vm6, %v1934_v46, %v1992_v18  ;;  %vm1974_vm7 = vcmp.gt.f32.partialorder %v1926_v40, 0.0  ;;  %v1990_v7 = vmul.f32 0.01, %v1926_v40  ;;  %v1947_v13 = vadd.f32 %v3062_v44, %v4238_v48 }
 0x49c   : > { %v2071_v33 = vmul.f32 %v4243_v47, %v2008_v31  ;;  %v1938_v2 = vpop.f32.mrf.mxu0  ;;  %3084 = vmatprep.mubr.bf16.mxu1 %v2126_v61  ;;  %v2089_v28 = vadd.f32 %v4250_v39, %v2068_v36 }
 0x49d   : > { %v2006_v19 = vsel %vm1974_vm7, %v1926_v40, %v1990_v7  ;;  %vm1979_vm8 = vcmp.gt.f32.partialorder %v1947_v13, 0.0  ;;  %v1995_v52 = vmul.f32 0.01, %v1947_v13  ;;  %v1939_v43 = vadd.f32 %v4238_v48, %v1938_v2  ;;  %3085 = vmatmul.mubr.bf16.vlgmr.msra.gmra.mxu1 %v2127_v16 }
 0x49e   : > { %v2069_v38 = vmul.f32 %v4243_v47, %v2006_v19  ;;  %3140 = vmatpush3.bf16.msra.mxu1 %v4137_v27  ;;  %v3063_v41 = vpop.f32.mrf.mxu0  ;;  %v2092_v58 = vadd.f32 %v4250_v39, %v2071_v33 }
 0x49f   : > { %vm1977_vm9 = vcmp.gt.f32.partialorder %v1939_v43, 0.0  ;;  %v1993_v12 = vmul.f32 0.01, %v1939_v43  ;;  %v1950_v51 = vadd.f32 %v3063_v41, %v4238_v48  ;;  %3133 = vmatprep.subr.bf16.mxu1 %v4164_v45  ;;  %v2011_v57 = vsel %vm1979_vm8, %v1947_v13, %v1995_v52 }
 0x4a0   : > { %v1941_v59 = vpop.f32.mrf.mxu0  ;;  %v2090_v32 = vadd.f32 %v4250_v39, %v2069_v38  ;;  %v2129_v63 = vpack.c.bf16 %v2092_v58, %v2091_v15  ;;  %v2074_v10 = vmul.f32 %v4243_v47, %v2011_v57 }
 0x4a1   : > { %v2009_v24 = vsel %vm1977_vm9, %v1939_v43, %v1993_v12  ;;  %vm1980_vm10 = vcmp.gt.f32.partialorder %v1950_v51, 0.0  ;;  %v1996_v27 = vmul.f32 0.01, %v1950_v51  ;;  %v1942_v35 = vadd.f32 %v4238_v48, %v1941_v59 }
 0x4a2   : > { %3141 = vmatpush3.bf16.msra.mxu1 %v4164_v45  ;;  %v3066_v20 = vpop.f32.mrf.mxu0  ;;  %v2128_v29 = vpack.c.bf16 %v2090_v32, %v2089_v28  ;;  %v2072_v46 = vmul.f32 %v4243_v47, %v2009_v24  ;;  %v2095_v7 = vadd.f32 %v4250_v39, %v2074_v10 }
 0x4a3   : > { %v2012_v11 = vsel %vm1980_vm10, %v1950_v51, %v1996_v27  ;;  %vm1978_vm11 = vcmp.gt.f32.partialorder %v1942_v35, 0.0  ;;  %v1994_v49 = vmul.f32 0.01, %v1942_v35  ;;  %v1963_v21 = vadd.f32 %v3066_v20, %v4238_v48  ;;  %3134 = vmatprep.subr.bf16.mxu1 %v4174_v42 }
 0x4a4   : > { %v2075_v53 = vmul.f32 %v4243_v47, %v2012_v11  ;;  %v1954_v14 = vpop.f32.mrf.mxu0  ;;  %3088 = vmatprep.mubr.bf16.mxu1 %v2128_v29  ;;  %v2093_v61 = vadd.f32 %v4250_v39, %v2072_v46 }
 0x4a5   : > { %v2010_v62 = vsel %vm1978_vm11, %v1942_v35, %v1994_v49  ;;  %v1955_v45 = vadd.f32 %v4238_v48, %v1954_v14  ;;  %3089 = vmatmul.mubr.bf16.gmra.mxu1 %v2129_v63  ;;  %vm1983_vm12 = vcmp.gt.f32.partialorder %v1963_v21, 0.0  ;;  %v1999_v1 = vmul.f32 0.01, %v1963_v21 }
 0x4a6   : > { %v2073_v25 = vmul.f32 %v4243_v47, %v2010_v62  ;;  %3142 = vmatpush3.bf16.msra.mxu1 %v4174_v42  ;;  %v3067_v37 = vpop.f32.mrf.mxu0  ;;  %v2096_v16 = vadd.f32 %v4250_v39, %v2075_v53 }
 0x4a7   : > { %vm1981_vm13 = vcmp.gt.f32.partialorder %v1955_v45, 0.0  ;;  %v1997_v18 = vmul.f32 0.01, %v1955_v45  ;;  %v1966_v40 = vadd.f32 %v3067_v37, %v4238_v48  ;;  %3135 = vmatprep.subr.bf16.mxu1 %v4186_v5  ;;  %v2015_v36 = vsel %vm1983_vm12, %v1963_v21, %v1999_v1 }
 0x4a8   : > { %v1957_v44 = vpop.f32.mrf.mxu0  ;;  %v2094_v31 = vadd.f32 %v4250_v39, %v2073_v25  ;;  %v2131_v52 = vpack.c.bf16 %v2096_v16, %v2095_v7  ;;  %v2078_v41 = vmul.f32 %v4243_v47, %v2015_v36 }
 0x4a9   : > { %v2013_v13 = vsel %vm1981_vm13, %v1955_v45, %v1997_v18  ;;  %vm1984_vm14 = vcmp.gt.f32.partialorder %v1966_v40, 0.0  ;;  %v2000_v4 = vmul.f32 0.01, %v1966_v40  ;;  %v1958_v42 = vadd.f32 %v4238_v48, %v1957_v44 }
 0x4aa   : > { %3143 = vmatpush3.bf16.msra.mxu1 %v4186_v5  ;;  %v2130_v33 = vpack.c.bf16 %v2094_v31, %v2093_v61  ;;  %v2076_v43 = vmul.f32 %v4243_v47, %v2013_v13  ;;  %v2099_v57 = vadd.f32 %v4250_v39, %v2078_v41 }
 0x4ab   : > { %v2016_v2 = vsel %vm1984_vm14, %v1966_v40, %v2000_v4  ;;  %vm1982_vm15 = vcmp.gt.f32.partialorder %v1958_v42, 0.0  ;;  %v1998_v19 = vmul.f32 0.01, %v1958_v42  ;;  %3136 = vmatprep.subr.bf16.mxu1 %v4196_v3 }
 0x4ac   : > { %v2079_v38 = vmul.f32 %v4243_v47, %v2016_v2  ;;  %3092 = vmatprep.mubr.bf16.mxu1 %v2130_v33  ;;  %v2097_v12 = vadd.f32 %v4250_v39, %v2076_v43 }
 0x4ad   : > { %v2014_v58 = vsel %vm1982_vm15, %v1958_v42, %v1998_v19  ;;  %3093 = vmatmul.mubr.bf16.gmra.mxu1 %v2131_v52 }
 0x4ae   : > { %v2077_v48 = vmul.f32 %v4243_v47, %v2014_v58  ;;  %3144 = vmatpush3.bf16.msra.mxu1 %v4196_v3  ;;  %v2100_v5 = vadd.f32 %v4250_v39, %v2079_v38  ;;  %v3118_v3 = vpop.f32.mrf.mxu0 }
 0x4af   : > { %3137 = vmatprep.subr.bf16.mxu1 %v4204_v50 }
 0x4b0   : > { %v2098_v51 = vadd.f32 %v4250_v39, %v2077_v48  ;;  %v2133_v28 = vpack.c.bf16 %v2100_v5, %v2099_v57  ;;  %v2378_v55 = vpop.f32.mrf.mxu0 }
 0x4b2   : > { %3145 = vmatpush3.bf16.msra.mxu1 %v4204_v50  ;;  %v2132_v59 = vpack.c.bf16 %v2098_v51, %v2097_v12  ;;  %v3119_v9 = vpop.f32.mrf.mxu0 }
 0x4b3   : > { %3138 = vmatprep.subr.bf16.mxu1 %v4215_v0 }
 0x4b4   : > { %3096 = vmatprep.mubr.bf16.mxu1 %v2132_v59 }
 0x4b5   : > { %3097 = vmatmul.mubr.bf16.gmra.mxu1 %v2133_v28 }
 0x4b6   : > { %3146 = vmatpush3.bf16.msra.mxu1 %v4215_v0  ;;  %3124 = vmatprep.mubr.bf16.mxu1 %v2105_v30  ;;  %v2381_v30 = vpop.f32.mrf.mxu0  ;;  %v4320_v0 = vld [vmem:[#allocation5 + $0x17] ss:$0 sm:$0xff] }
 0x4b7   : > { %3139 = vmatprep.subr.bf16.mxu1 %v4220_v26 }
 0x4b8   : > { %v3122_v47 = vpop.f32.mrf.mxu0 }
 0x4ba   : > { %3147 = vmatpush3.bf16.msra.mxu1 %v4220_v26  ;;  %v2394_v17 = vpop.f32.mrf.mxu0 }
 0x4bc   : > { %v3123_v27 = vpop.f32.mrf.mxu0 }
 0x4bd   : > { %3125 = vmatmul.mubr.bf16.vlgmr.msra.gmra.mxu1 %v2106_v23 }
 0x4be   : > { %3128 = vmatprep.mubr.bf16.mxu1 %v2107_v56  ;;  %v2397_v21 = vpop.f32.mrf.mxu0 }
 0x4c5   : > { %3129 = vmatmul.mubr.bf16.gmra.mxu1 %v2108_v8 }
 0x55d   : > { %v3086_v50 = vpop.f32.mrf.mxu1 }
 0x55e   : > { %v2387_v26 = vadd.f32 %v3118_v3, %v3086_v50 }
 0x55f   : > { %v2233_v54 = vpop.f32.mrf.mxu1 }
 0x560   : > { %v2448_v6 = vadd.f32 %v4320_v0, %v2387_v26  ;;  %v2379_v23 = vadd.f32 %v2378_v55, %v2233_v54 }
 0x561   : > { %v3087_v39 = vpop.f32.mrf.mxu1 }
 0x562   : > { %2464 = vst [vmem:[%s4325_s18 + $0x10] sm:$0xff] %v2448_v6  ;;  %v2446_v22 = vadd.f32 %v4320_v0, %v2379_v23  ;;  %v2390_v34 = vadd.f32 %v3119_v9, %v3087_v39 }
 0x563   : > { %v2236_v60 = vpop.f32.mrf.mxu1 }
 0x564   : > { %2462 = vst [vmem:[%s4325_s18] sm:$0xff] %v2446_v22  ;;  %v2449_v56 = vadd.f32 %v4320_v0, %v2390_v34  ;;  %v2382_v8 = vadd.f32 %v2381_v30, %v2236_v60 }
 0x565   : > { %v3090_v32 = vpop.f32.mrf.mxu1 }
 0x566   : > { %2465 = vst [vmem:[%s4325_s18 + $0x18] sm:$0xff] %v2449_v56  ;;  %v2447_v15 = vadd.f32 %v4320_v0, %v2382_v8  ;;  %v2403_v24 = vadd.f32 %v3122_v47, %v3090_v32 }
 0x567   : > { %v2249_v35 = vpop.f32.mrf.mxu1 }
 0x568   : > { %2463 = vst [vmem:[%s4325_s18 + $0x8] sm:$0xff] %v2447_v15  ;;  %v2452_v20 = vadd.f32 %v4320_v0, %v2403_v24  ;;  %v2395_v29 = vadd.f32 %v2394_v17, %v2249_v35 }
 0x569   : > { %v3091_v63 = vpop.f32.mrf.mxu1 }
 0x56a   : > { %2468 = vst [vmem:[%s4325_s18 + $0x30] sm:$0xff] %v2452_v20  ;;  %v2450_v11 = vadd.f32 %v4320_v0, %v2395_v29  ;;  %v2406_v49 = vadd.f32 %v3123_v27, %v3091_v63 }
 0x56b   : > { %v2252_v10 = vpop.f32.mrf.mxu1 }
 0x56c   : > { %2466 = vst [vmem:[%s4325_s18 + $0x20] sm:$0xff] %v2450_v11  ;;  %v2453_v46 = vadd.f32 %v4320_v0, %v2406_v49  ;;  %v2398_v53 = vadd.f32 %v2397_v21, %v2252_v10 }
 0x56d   : > { %v3094_v14 = vpop.f32.mrf.mxu1 }
 0x56e   : > { %2469 = vst [vmem:[%s4325_s18 + $0x38] sm:$0xff] %v2453_v46  ;;  %v2451_v62 = vadd.f32 %v4320_v0, %v2398_v53 }
 0x56f   : > { %v2265_v45 = vpop.f32.mrf.mxu1 }
 0x570   : > { %2467 = vst [vmem:[%s4325_s18 + $0x28] sm:$0xff] %v2451_v62 }
 0x571   : > { %v3095_v25 = vpop.f32.mrf.mxu1 }
 0x573   : > { %v2268_v1 = vpop.f32.mrf.mxu1 }
 0x575   : > { %v3098_v37 = vpop.f32.mrf.mxu1 }
 0x577   : > { %v2281_v18 = vpop.f32.mrf.mxu1 }
 0x579   : > { %v3099_v40 = vpop.f32.mrf.mxu1 }
 0x57b   : > { %v2284_v16 = vpop.f32.mrf.mxu1 }
 0x57d   : > { %v3126_v44 = vpop.f32.mrf.mxu1 }
 0x57e   : > { %v2419_v61 = vadd.f32 %v3126_v44, %v3094_v14 }
 0x57f   : > { %v2410_v31 = vpop.f32.mrf.mxu1 }
 0x580   : > { %v2456_v7 = vadd.f32 %v4320_v0, %v2419_v61  ;;  %v2411_v13 = vadd.f32 %v2410_v31, %v2265_v45 }
 0x581   : > { %v3127_v4 = vpop.f32.mrf.mxu1 }
 0x582   : > { %2472 = vst [vmem:[%s4325_s18 + $0x50] sm:$0xff] %v2456_v7  ;;  %v2454_v42 = vadd.f32 %v4320_v0, %v2411_v13  ;;  %v2422_v36 = vadd.f32 %v3127_v4, %v3095_v25 }
 0x583   : > { %v2413_v33 = vpop.f32.mrf.mxu1 }
 0x584   : > { %2470 = vst [vmem:[%s4325_s18 + $0x40] sm:$0xff] %v2454_v42  ;;  %v2457_v2 = vadd.f32 %v4320_v0, %v2422_v36  ;;  %v2414_v19 = vadd.f32 %v2413_v33, %v2268_v1 }
 0x585   : > { %v3130_v52 = vpop.f32.mrf.mxu1 }
 0x586   : > { %2473 = vst [vmem:[%s4325_s18 + $0x58] sm:$0xff] %v2457_v2  ;;  %v2455_v43 = vadd.f32 %v4320_v0, %v2414_v19  ;;  %v2435_v38 = vadd.f32 %v3130_v52, %v3098_v37 }
 0x587   : > { %v2426_v41 = vpop.f32.mrf.mxu1 }
 0x588   : > { %2471 = vst [vmem:[%s4325_s18 + $0x48] sm:$0xff] %v2455_v43  ;;  %v2460_v58 = vadd.f32 %v4320_v0, %v2435_v38  ;;  %v2427_v48 = vadd.f32 %v2426_v41, %v2281_v18 }
 0x589   : > { %v3131_v5 = vpop.f32.mrf.mxu1 }
 0x58a   : > { %2476 = vst [vmem:[%s4325_s18 + $0x70] sm:$0xff] %v2460_v58  ;;  %v2458_v12 = vadd.f32 %v4320_v0, %v2427_v48  ;;  %v2438_v51 = vadd.f32 %v3131_v5, %v3099_v40 }
 0x58b   : > { %v2429_v57 = vpop.f32.mrf.mxu1 }
 0x58c   : > { %2474 = vst [vmem:[%s4325_s18 + $0x60] sm:$0xff] %v2458_v12  ;;  %v2461_v59 = vadd.f32 %v4320_v0, %v2438_v51  ;;  %v2430_v28 = vadd.f32 %v2429_v57, %v2284_v16 }
 0x58e   : > { %2477 = vst [vmem:[%s4325_s18 + $0x78] sm:$0xff] %v2461_v59  ;;  %v2459_v3 = vadd.f32 %v4320_v0, %v2430_v28 }
 0x590   : > { %2475 = vst [vmem:[%s4325_s18 + $0x68] sm:$0xff] %v2459_v3 }
 0x591   : > { %3386 = shalt.err (!%p3383_p3)
}
 0x592   : > { %s3387_s22 = scalar_lea.hbm %s4360_s4, 2048  ;;  %s3391_s30 = scalar_lea.hbm %s4411_s3, 4096 }
 0x593   : > { %p3388_p11 = scmp.ne.s32.totalorder %s4360_s4, %s3387_s22  ;;  %p3392_p4 = scmp.lt.s32.totalorder %s4360_s4, %s4411_s3 }
 0x594   : > { %p3393_p6 = scmp.lt.s32.totalorder %s3391_s30, %s3387_s22 }
 0x595   : > { %p3389_p9 = pnand %p3388_p11, %p4426_p2 }
 0x596   : > { %p3394_p8 = por %p3393_p6, %p3392_p4 }
 0x597   : > { %p3390_p1 = pneg %p3389_p9 }
 0x599   : > { %p3395_p10 = pnand %p3394_p8, %p3390_p1 }
 0x59b   : > { %3398 = shalt.err (!%p3395_p10)
}
 0x59c   : > { %s3451_s5 = smov 128   ;;  %s3452_s18 = smov 8  }
 0x59d   : > { %3158 = dma.vmem_to_hbm [thread:$0]  (%p4426_p2), %s4362_s27, 2048, %s4360_s4, %s2479_s16, %s3451_s5, %s3451_s5, %s3452_s18  }
 0x59e PF: > { %s2507_s20 = sand.u32 1, %s3429_s12   ;;  %p4427_p7 = scmp.ne.s32.totalorder %s4417_s19, 0 }
 0x59f   : > { %p4428_p12 = scmp.ge.s32.totalorder %s3441_s15, 2  ;;  %s2508_s28 = scalar_lea.sflag [#allocation4], %s2507_s20 }
 0x5a1   : > { %p3172_p13 = pnand %p4428_p12, %p4427_p7 }
 0x5a3   : > { %p3173_p0 = pneg %p3172_p13 }
 0x5a5   : > { %3424 = dma.done.wait (%p3173_p0), %s2508_s28, 2048  }
 0x5a6   : > { %3426 = vsyncadd (%p3173_p0), %s2508_s28, 4294965248  ;;  %p17_p5 = scmp.ge.s32.totalorder %s3548_s9, 4   ;;  %s4429_s12 = smov %s3433_s13 }
 0x5a7   : > { %s4430_s13 = smov %s3437_s14  ;;  %s4431_s14 = smov %s3557_s17 }
 0x5a8   : > { %s4432_s15 = smov %s3548_s9  ;;  %19 = sbr.rel (!%p17_p5) target bundleno = 6 (0x6), region = 93 }
 0x5ad   :  { %2513 = vsyncpa [#allocation3], 1 }
 0x5ae   :  { %2515 = vsyncpa [#allocation3 + $0x1], 1 }
 0x5af   :  { %2516 = vsyncpa [#allocation6], 1 }
 0x5b0   :  { %2517 = vsyncpa [#allocation4], 1 }
 0x5b1   :  { %2519 = vsyncpa [#allocation4 + $0x1], 1 }

</bundles_post_ra>
